<compile_context>
chip_gen: v5e
topology: v5e:2x2
jax: 0.10.0
libtpu: 0.0.40
codegen_flags: <defaults>
</compile_context>

<pallas_src>
import functools

import jax
import jax.numpy as jnp
from jax.experimental import pallas as pl
from jax.experimental.pallas import tpu as pltpu

LAYERS = [3, 100, 100, 100, 100, 100, 100, 100, 100, 1]
N_LIN = len(LAYERS) - 1          # 9 linear layers
N_MXU = N_LIN - 2                # 7 hidden 100->100 MXU matmuls (layers 1..7)
F_IN = LAYERS[0]                 # 3 input features (x, y, t)
PAD = 128                        # padded feature width (lane dim)


def _use_bf16_activations():
    """bf16 tanh/bias chain only where the VPU/EUP have a bf16 path (v6e/v7x)."""
    try:
        kind = jax.devices()[0].device_kind.lower()
    except Exception:
        return False
    return ("v6" in kind) or ("v7" in kind)


def mlp_kernel(x_ref, w_in_ref, w_hid_ref, w_out_ref, b_ref, o_ref, *, act_bf16):
    """One batch tile of the full MLP.

    x_ref:     (TM, 3)             raw input tile (f32)
    w_in_ref:  (8, PAD)            layer-0 weight, transposed & zero padded (f32)
    w_hid_ref: (N_MXU, PAD, PAD)   layers 1..7 weights, transposed & padded (bf16)
    w_out_ref: (1, PAD)            final 100->1 weight row, zero padded (f32)
    b_ref:     (N_LIN, PAD)        biases, zero padded (f32)
    o_ref:     (TM, 1)             output tile (f32)
    """
    act_dtype = jnp.bfloat16 if act_bf16 else jnp.float32

    # --- Layer 0 (3 -> 100) on the VPU: three rank-1 broadcast updates. -----
    x3 = x_ref[...].astype(jnp.float32)                      # (TM, 3)
    w0 = w_in_ref[...]                                       # (8, PAD)
    pre = (x3[:, 0:1] * w0[0:1, :]
           + x3[:, 1:2] * w0[1:2, :]
           + x3[:, 2:3] * w0[2:3, :]
           + b_ref[0])                                       # (TM, PAD) f32
    h = jnp.tanh(pre.astype(act_dtype))

    # --- Hidden layers 1..7: bf16 MXU matmul, f32 accumulate. ---------------
    for l in range(N_MXU):
        acc = jnp.dot(h.astype(jnp.bfloat16), w_hid_ref[l],
                      preferred_element_type=jnp.float32)    # (TM, PAD) f32
        h = jnp.tanh((acc + b_ref[l + 1]).astype(act_dtype))

    # --- Final layer (100 -> 1) on VPU + XLU lane-reduce (no MXU pass). -----
    hf = h.astype(jnp.float32)
    y = jnp.sum(hf * w_out_ref[...], axis=-1, keepdims=True)  # (TM, 1)
    y = y + b_ref[N_LIN - 1][:1]
    o_ref[...] = y.astype(o_ref.dtype)


@functools.partial(jax.jit, static_argnames=("tile_m", "act_bf16"))
def pinns_forward(xyt, w_in, w_hid, w_out, b_stack, *, tile_m=2048,
                  act_bf16=False):
    """xyt: (N, 3) float32 -> (N, 1) float32, matching PINNs.forward."""
    n = xyt.shape[0]

    # Round the requested tile up to a power of two (keeps the sublane count a
    # multiple of 8 through the shrink loop), then shrink for small batches so
    # the grid keeps >= 2 steps (both v7x TensorCores get work).
    tm = max(8, 1 << (int(tile_m) - 1).bit_length())
    while tm > 8 and pl.cdiv(n, tm) < 2:
        tm //= 2
    n_steps = pl.cdiv(n, tm)
    n_pad = n_steps * tm

    x = xyt.astype(jnp.float32)
    if n_pad != n:
        x = jnp.pad(x, ((0, n_pad - n), (0, 0)))             # cheap: (n,3) only

    cost = pl.CostEstimate(
        flops=2 * n_pad * (N_MXU * PAD * PAD + F_IN * PAD + PAD),
        transcendentals=n_pad * (N_LIN - 1) * PAD,
        bytes_accessed=(x.size * 4 + w_in.size * 4 + w_hid.size * 2
                        + w_out.size * 4 + b_stack.size * 4 + n_pad * 4),
    )

    kernel = functools.partial(mlp_kernel, act_bf16=act_bf16)

    out = pl.pallas_call(
        kernel,
        out_shape=jax.ShapeDtypeStruct((n_pad, 1), jnp.float32),
        grid_spec=pltpu.PrefetchScalarGridSpec(
            num_scalar_prefetch=0,
            grid=(n_steps,),
            in_specs=[
                pl.BlockSpec((tm, F_IN), lambda i: (i, 0)),            # input
                pl.BlockSpec((8, PAD), lambda i: (0, 0)),              # layer-0 W
                pl.BlockSpec((N_MXU, PAD, PAD), lambda i: (0, 0, 0)),  # hidden W
                pl.BlockSpec((1, PAD), lambda i: (0, 0)),              # final W
                pl.BlockSpec((N_LIN, PAD), lambda i: (0, 0)),          # biases
            ],
            out_specs=pl.BlockSpec((tm, 1), lambda i: (i, 0)),
        ),
        compiler_params=pltpu.CompilerParams(
            dimension_semantics=("parallel",),
            vmem_limit_bytes=32 * 1024 * 1024,
        ),
        cost_estimate=cost,
    )(x, w_in, w_hid, w_out, b_stack)

    return out[:n]


def init_params(key):
    """Xavier-normal weights (gain=1), zero biases; padded, stacked, bf16 hidden."""
    keys = jax.random.split(key, N_LIN)

    # Layer 0 (3 -> 100): keep f32, store transposed (in, out), pad to (8, PAD).
    std0 = (2.0 / (LAYERS[0] + LAYERS[1])) ** 0.5
    w0 = std0 * jax.random.normal(keys[0], (LAYERS[1], LAYERS[0]), jnp.float32)
    w_in = jnp.zeros((8, PAD), jnp.float32).at[:LAYERS[0], :LAYERS[1]].set(w0.T)

    # Layers 1..7 (100 -> 100): transposed (in, out), padded to (PAD, PAD), bf16.
    w_hid = jnp.zeros((N_MXU, PAD, PAD), jnp.float32)
    for i in range(1, N_LIN - 1):
        fan_in, fan_out = LAYERS[i], LAYERS[i + 1]
        std = (2.0 / (fan_in + fan_out)) ** 0.5
        w = std * jax.random.normal(keys[i], (fan_out, fan_in), jnp.float32)
        w_hid = w_hid.at[i - 1, :fan_in, :fan_out].set(w.T)
    w_hid = w_hid.astype(jnp.bfloat16)

    # Final layer (100 -> 1): single f32 lane-dense row for the VPU/XLU path.
    stdf = (2.0 / (LAYERS[-2] + LAYERS[-1])) ** 0.5
    wf = stdf * jax.random.normal(keys[N_LIN - 1], (LAYERS[-1], LAYERS[-2]),
                                  jnp.float32)
    w_out = jnp.zeros((1, PAD), jnp.float32).at[:, :LAYERS[-2]].set(wf)

    # Biases are zeros (nn.init.zeros_); padded region must stay zero.
    b_stack = jnp.zeros((N_LIN, PAD), jnp.float32)
    return w_in, w_hid, w_out, b_stack


def pinns_forward_ref(xyt, w_in, w_hid, w_out, b_stack):
    """Pure-JAX reference (same bf16-rounded hidden weights, f32 activations)."""
    h = xyt.astype(jnp.float32)
    h = jnp.tanh(h @ w_in[:F_IN, :LAYERS[1]] + b_stack[0, :LAYERS[1]])
    for i in range(1, N_LIN - 1):
        fi, fo = LAYERS[i], LAYERS[i + 1]
        h = jnp.tanh(h @ w_hid[i - 1, :fi, :fo].astype(jnp.float32)
                     + b_stack[i, :fo])
    fi = LAYERS[-2]
    return h @ w_out[0, :fi][:, None] + b_stack[N_LIN - 1, :1]


if __name__ == "__main__":
    key = jax.random.PRNGKey(0)
    k_param, k_x = jax.random.split(key)

    w_in, w_hid, w_out, b_stack = init_params(k_param)

    # Small deterministic batch of (x, y, t) collocation points.  N is
    # deliberately NOT a multiple of the tile to exercise the padded tail,
    # and the auto-shrunk tile gives a 2-step grid (v7x megacore friendly).
    N = 200
    xyt = jax.random.normal(k_x, (N, F_IN), jnp.float32)

    act_bf16 = _use_bf16_activations()   # bf16 tanh chain on v6e/v7x, f32 on v5e
    out = pinns_forward(xyt, w_in, w_hid, w_out, b_stack,
                        tile_m=2048, act_bf16=act_bf16)
    out = jax.block_until_ready(out)

    ref = pinns_forward_ref(xyt, w_in, w_hid, w_out, b_stack)
    assert out.shape == (N, 1), out.shape
    assert jnp.allclose(out, ref, atol=3e-2, rtol=3e-2), \
        float(jnp.max(jnp.abs(out - ref)))

    print("KERNEL_OK")
</pallas_src>

<mosaic_0001>
module attributes {stable_mosaic.version = 11 : i64} {
  func.func @mlp_kernel(%arg0: i32, %arg1: memref<128x3xf32, #tpu.memory_space<vmem>>, %arg2: memref<8x128xf32, #tpu.memory_space<vmem>>, %arg3: memref<7x128x128xbf16, #tpu.memory_space<vmem>>, %arg4: memref<1x128xf32, #tpu.memory_space<vmem>>, %arg5: memref<9x128xf32, #tpu.memory_space<vmem>>, %arg6: memref<128x1xf32, #tpu.memory_space<vmem>>) attributes {dimension_semantics = [#tpu.dimension_semantics<parallel>], iteration_bounds = array<i64: 2>, scalar_prefetch = 0 : i64, scratch_operands = 0 : i64, tpu.core_type = #tpu.core_type<tc>, window_params = [{transform_indices = @transform_0, window_bounds = array<i64: 128, 3>}, {pipeline_mode = #tpu.pipeline_mode<synchronous>, transform_indices = @transform_1, window_bounds = array<i64: 8, 128>}, {pipeline_mode = #tpu.pipeline_mode<synchronous>, transform_indices = @transform_2, window_bounds = array<i64: 7, 128, 128>}, {pipeline_mode = #tpu.pipeline_mode<synchronous>, transform_indices = @transform_3, window_bounds = array<i64: 1, 128>}, {pipeline_mode = #tpu.pipeline_mode<synchronous>, transform_indices = @transform_4, window_bounds = array<i64: 9, 128>}, {transform_indices = @transform_5, window_bounds = array<i64: 128, 1>}]} {
    %c0 = arith.constant 0 : index
    %c0_0 = arith.constant 0 : index
    %0 = vector.load %arg1[%c0, %c0_0] : memref<128x3xf32, #tpu.memory_space<vmem>>, vector<128x3xf32>
    %c0_1 = arith.constant 0 : index
    %c0_2 = arith.constant 0 : index
    %1 = vector.load %arg2[%c0_1, %c0_2] : memref<8x128xf32, #tpu.memory_space<vmem>>, vector<8x128xf32>
    %2 = vector.extract_strided_slice %0 {offsets = [0, 0], sizes = [128, 1], strides = [1, 1]} : vector<128x3xf32> to vector<128x1xf32>
    %3 = vector.extract_strided_slice %1 {offsets = [0, 0], sizes = [1, 128], strides = [1, 1]} : vector<8x128xf32> to vector<1x128xf32>
    %4 = vector.broadcast %2 : vector<128x1xf32> to vector<128x128xf32>
    %5 = vector.broadcast %3 : vector<1x128xf32> to vector<128x128xf32>
    %6 = arith.mulf %4, %5 : vector<128x128xf32>
    %7 = vector.extract_strided_slice %0 {offsets = [0, 1], sizes = [128, 1], strides = [1, 1]} : vector<128x3xf32> to vector<128x1xf32>
    %8 = vector.extract_strided_slice %1 {offsets = [1, 0], sizes = [1, 128], strides = [1, 1]} : vector<8x128xf32> to vector<1x128xf32>
    %9 = vector.broadcast %7 : vector<128x1xf32> to vector<128x128xf32>
    %10 = vector.broadcast %8 : vector<1x128xf32> to vector<128x128xf32>
    %11 = arith.mulf %9, %10 : vector<128x128xf32>
    %12 = arith.addf %6, %11 : vector<128x128xf32>
    %13 = vector.extract_strided_slice %0 {offsets = [0, 2], sizes = [128, 1], strides = [1, 1]} : vector<128x3xf32> to vector<128x1xf32>
    %14 = vector.extract_strided_slice %1 {offsets = [2, 0], sizes = [1, 128], strides = [1, 1]} : vector<8x128xf32> to vector<1x128xf32>
    %15 = vector.broadcast %13 : vector<128x1xf32> to vector<128x128xf32>
    %16 = vector.broadcast %14 : vector<1x128xf32> to vector<128x128xf32>
    %17 = arith.mulf %15, %16 : vector<128x128xf32>
    %18 = arith.addf %12, %17 : vector<128x128xf32>
    %c0_3 = arith.constant 0 : index
    %c0_4 = arith.constant 0 : index
    %19 = vector.load %arg5[%c0_3, %c0_4] : memref<9x128xf32, #tpu.memory_space<vmem>>, vector<1x128xf32>
    %20 = vector.shape_cast %19 : vector<1x128xf32> to vector<128xf32>
    %21 = vector.shape_cast %20 : vector<128xf32> to vector<1x128xf32>
    %22 = vector.broadcast %21 : vector<1x128xf32> to vector<128x128xf32>
    %23 = arith.addf %18, %22 : vector<128x128xf32>
    %24 = math.tanh %23 : vector<128x128xf32>
    %25 = arith.truncf %24 : vector<128x128xf32> to vector<128x128xbf16>
    %c0_5 = arith.constant 0 : index
    %c0_6 = arith.constant 0 : index
    %c0_7 = arith.constant 0 : index
    %26 = vector.load %arg3[%c0_5, %c0_6, %c0_7] : memref<7x128x128xbf16, #tpu.memory_space<vmem>>, vector<1x128x128xbf16>
    %27 = vector.shape_cast %26 : vector<1x128x128xbf16> to vector<128x128xbf16>
    %cst = arith.constant dense<0.000000e+00> : vector<128x128xf32>
    %28 = tpu.matmul %25, %27, %cst {dimension_numbers = #tpu.dot_dimension_numbers<[1], [0], [0], [1], [0, 0, 1, 1], [], []>} : vector<128x128xbf16>, vector<128x128xbf16>, vector<128x128xf32> -> vector<128x128xf32>
    %c1 = arith.constant 1 : index
    %c0_8 = arith.constant 0 : index
    %29 = vector.load %arg5[%c1, %c0_8] : memref<9x128xf32, #tpu.memory_space<vmem>>, vector<1x128xf32>
    %30 = vector.shape_cast %29 : vector<1x128xf32> to vector<128xf32>
    %31 = vector.shape_cast %30 : vector<128xf32> to vector<1x128xf32>
    %32 = vector.broadcast %31 : vector<1x128xf32> to vector<128x128xf32>
    %33 = arith.addf %28, %32 : vector<128x128xf32>
    %34 = math.tanh %33 : vector<128x128xf32>
    %35 = arith.truncf %34 : vector<128x128xf32> to vector<128x128xbf16>
    %c1_9 = arith.constant 1 : index
    %c0_10 = arith.constant 0 : index
    %c0_11 = arith.constant 0 : index
    %36 = vector.load %arg3[%c1_9, %c0_10, %c0_11] : memref<7x128x128xbf16, #tpu.memory_space<vmem>>, vector<1x128x128xbf16>
    %37 = vector.shape_cast %36 : vector<1x128x128xbf16> to vector<128x128xbf16>
    %cst_12 = arith.constant dense<0.000000e+00> : vector<128x128xf32>
    %38 = tpu.matmul %35, %37, %cst_12 {dimension_numbers = #tpu.dot_dimension_numbers<[1], [0], [0], [1], [0, 0, 1, 1], [], []>} : vector<128x128xbf16>, vector<128x128xbf16>, vector<128x128xf32> -> vector<128x128xf32>
    %c2 = arith.constant 2 : index
    %c0_13 = arith.constant 0 : index
    %39 = vector.load %arg5[%c2, %c0_13] : memref<9x128xf32, #tpu.memory_space<vmem>>, vector<1x128xf32>
    %40 = vector.shape_cast %39 : vector<1x128xf32> to vector<128xf32>
    %41 = vector.shape_cast %40 : vector<128xf32> to vector<1x128xf32>
    %42 = vector.broadcast %41 : vector<1x128xf32> to vector<128x128xf32>
    %43 = arith.addf %38, %42 : vector<128x128xf32>
    %44 = math.tanh %43 : vector<128x128xf32>
    %45 = arith.truncf %44 : vector<128x128xf32> to vector<128x128xbf16>
    %c2_14 = arith.constant 2 : index
    %c0_15 = arith.constant 0 : index
    %c0_16 = arith.constant 0 : index
    %46 = vector.load %arg3[%c2_14, %c0_15, %c0_16] : memref<7x128x128xbf16, #tpu.memory_space<vmem>>, vector<1x128x128xbf16>
    %47 = vector.shape_cast %46 : vector<1x128x128xbf16> to vector<128x128xbf16>
    %cst_17 = arith.constant dense<0.000000e+00> : vector<128x128xf32>
    %48 = tpu.matmul %45, %47, %cst_17 {dimension_numbers = #tpu.dot_dimension_numbers<[1], [0], [0], [1], [0, 0, 1, 1], [], []>} : vector<128x128xbf16>, vector<128x128xbf16>, vector<128x128xf32> -> vector<128x128xf32>
    %c3 = arith.constant 3 : index
    %c0_18 = arith.constant 0 : index
    %49 = vector.load %arg5[%c3, %c0_18] : memref<9x128xf32, #tpu.memory_space<vmem>>, vector<1x128xf32>
    %50 = vector.shape_cast %49 : vector<1x128xf32> to vector<128xf32>
    %51 = vector.shape_cast %50 : vector<128xf32> to vector<1x128xf32>
    %52 = vector.broadcast %51 : vector<1x128xf32> to vector<128x128xf32>
    %53 = arith.addf %48, %52 : vector<128x128xf32>
    %54 = math.tanh %53 : vector<128x128xf32>
    %55 = arith.truncf %54 : vector<128x128xf32> to vector<128x128xbf16>
    %c3_19 = arith.constant 3 : index
    %c0_20 = arith.constant 0 : index
    %c0_21 = arith.constant 0 : index
    %56 = vector.load %arg3[%c3_19, %c0_20, %c0_21] : memref<7x128x128xbf16, #tpu.memory_space<vmem>>, vector<1x128x128xbf16>
    %57 = vector.shape_cast %56 : vector<1x128x128xbf16> to vector<128x128xbf16>
    %cst_22 = arith.constant dense<0.000000e+00> : vector<128x128xf32>
    %58 = tpu.matmul %55, %57, %cst_22 {dimension_numbers = #tpu.dot_dimension_numbers<[1], [0], [0], [1], [0, 0, 1, 1], [], []>} : vector<128x128xbf16>, vector<128x128xbf16>, vector<128x128xf32> -> vector<128x128xf32>
    %c4 = arith.constant 4 : index
    %c0_23 = arith.constant 0 : index
    %59 = vector.load %arg5[%c4, %c0_23] : memref<9x128xf32, #tpu.memory_space<vmem>>, vector<1x128xf32>
    %60 = vector.shape_cast %59 : vector<1x128xf32> to vector<128xf32>
    %61 = vector.shape_cast %60 : vector<128xf32> to vector<1x128xf32>
    %62 = vector.broadcast %61 : vector<1x128xf32> to vector<128x128xf32>
    %63 = arith.addf %58, %62 : vector<128x128xf32>
    %64 = math.tanh %63 : vector<128x128xf32>
    %65 = arith.truncf %64 : vector<128x128xf32> to vector<128x128xbf16>
    %c4_24 = arith.constant 4 : index
    %c0_25 = arith.constant 0 : index
    %c0_26 = arith.constant 0 : index
    %66 = vector.load %arg3[%c4_24, %c0_25, %c0_26] : memref<7x128x128xbf16, #tpu.memory_space<vmem>>, vector<1x128x128xbf16>
    %67 = vector.shape_cast %66 : vector<1x128x128xbf16> to vector<128x128xbf16>
    %cst_27 = arith.constant dense<0.000000e+00> : vector<128x128xf32>
    %68 = tpu.matmul %65, %67, %cst_27 {dimension_numbers = #tpu.dot_dimension_numbers<[1], [0], [0], [1], [0, 0, 1, 1], [], []>} : vector<128x128xbf16>, vector<128x128xbf16>, vector<128x128xf32> -> vector<128x128xf32>
    %c5 = arith.constant 5 : index
    %c0_28 = arith.constant 0 : index
    %69 = vector.load %arg5[%c5, %c0_28] : memref<9x128xf32, #tpu.memory_space<vmem>>, vector<1x128xf32>
    %70 = vector.shape_cast %69 : vector<1x128xf32> to vector<128xf32>
    %71 = vector.shape_cast %70 : vector<128xf32> to vector<1x128xf32>
    %72 = vector.broadcast %71 : vector<1x128xf32> to vector<128x128xf32>
    %73 = arith.addf %68, %72 : vector<128x128xf32>
    %74 = math.tanh %73 : vector<128x128xf32>
    %75 = arith.truncf %74 : vector<128x128xf32> to vector<128x128xbf16>
    %c5_29 = arith.constant 5 : index
    %c0_30 = arith.constant 0 : index
    %c0_31 = arith.constant 0 : index
    %76 = vector.load %arg3[%c5_29, %c0_30, %c0_31] : memref<7x128x128xbf16, #tpu.memory_space<vmem>>, vector<1x128x128xbf16>
    %77 = vector.shape_cast %76 : vector<1x128x128xbf16> to vector<128x128xbf16>
    %cst_32 = arith.constant dense<0.000000e+00> : vector<128x128xf32>
    %78 = tpu.matmul %75, %77, %cst_32 {dimension_numbers = #tpu.dot_dimension_numbers<[1], [0], [0], [1], [0, 0, 1, 1], [], []>} : vector<128x128xbf16>, vector<128x128xbf16>, vector<128x128xf32> -> vector<128x128xf32>
    %c6 = arith.constant 6 : index
    %c0_33 = arith.constant 0 : index
    %79 = vector.load %arg5[%c6, %c0_33] : memref<9x128xf32, #tpu.memory_space<vmem>>, vector<1x128xf32>
    %80 = vector.shape_cast %79 : vector<1x128xf32> to vector<128xf32>
    %81 = vector.shape_cast %80 : vector<128xf32> to vector<1x128xf32>
    %82 = vector.broadcast %81 : vector<1x128xf32> to vector<128x128xf32>
    %83 = arith.addf %78, %82 : vector<128x128xf32>
    %84 = math.tanh %83 : vector<128x128xf32>
    %85 = arith.truncf %84 : vector<128x128xf32> to vector<128x128xbf16>
    %c6_34 = arith.constant 6 : index
    %c0_35 = arith.constant 0 : index
    %c0_36 = arith.constant 0 : index
    %86 = vector.load %arg3[%c6_34, %c0_35, %c0_36] : memref<7x128x128xbf16, #tpu.memory_space<vmem>>, vector<1x128x128xbf16>
    %87 = vector.shape_cast %86 : vector<1x128x128xbf16> to vector<128x128xbf16>
    %cst_37 = arith.constant dense<0.000000e+00> : vector<128x128xf32>
    %88 = tpu.matmul %85, %87, %cst_37 {dimension_numbers = #tpu.dot_dimension_numbers<[1], [0], [0], [1], [0, 0, 1, 1], [], []>} : vector<128x128xbf16>, vector<128x128xbf16>, vector<128x128xf32> -> vector<128x128xf32>
    %c7 = arith.constant 7 : index
    %c0_38 = arith.constant 0 : index
    %89 = vector.load %arg5[%c7, %c0_38] : memref<9x128xf32, #tpu.memory_space<vmem>>, vector<1x128xf32>
    %90 = vector.shape_cast %89 : vector<1x128xf32> to vector<128xf32>
    %91 = vector.shape_cast %90 : vector<128xf32> to vector<1x128xf32>
    %92 = vector.broadcast %91 : vector<1x128xf32> to vector<128x128xf32>
    %93 = arith.addf %88, %92 : vector<128x128xf32>
    %94 = math.tanh %93 : vector<128x128xf32>
    %c0_39 = arith.constant 0 : index
    %c0_40 = arith.constant 0 : index
    %95 = vector.load %arg4[%c0_39, %c0_40] : memref<1x128xf32, #tpu.memory_space<vmem>>, vector<1x128xf32>
    %96 = vector.broadcast %95 : vector<1x128xf32> to vector<128x128xf32>
    %97 = arith.mulf %94, %96 : vector<128x128xf32>
    %cst_41 = arith.constant dense<0.000000e+00> : vector<128xf32>
    %98 = vector.multi_reduction <add>, %97, %cst_41 [1] : vector<128x128xf32> to vector<128xf32>
    %99 = vector.shape_cast %98 : vector<128xf32> to vector<128x1xf32>
    %c8 = arith.constant 8 : index
    %c0_42 = arith.constant 0 : index
    %100 = vector.load %arg5[%c8, %c0_42] : memref<9x128xf32, #tpu.memory_space<vmem>>, vector<1x128xf32>
    %101 = vector.shape_cast %100 : vector<1x128xf32> to vector<128xf32>
    %102 = vector.extract_strided_slice %101 {offsets = [0], sizes = [1], strides = [1]} : vector<128xf32> to vector<1xf32>
    %103 = vector.shape_cast %102 : vector<1xf32> to vector<1x1xf32>
    %104 = vector.broadcast %103 : vector<1x1xf32> to vector<128x1xf32>
    %105 = arith.addf %99, %104 : vector<128x1xf32>
    %c0_43 = arith.constant 0 : index
    %c0_44 = arith.constant 0 : index
    %106 = vector.load %arg6[%c0_43, %c0_44] : memref<128x1xf32, #tpu.memory_space<vmem>>, vector<128x1xf32>
    tpu.vector_store %arg6[%c0_43, %c0_44], %105 {strides = array<i32>} : memref<128x1xf32, #tpu.memory_space<vmem>>, vector<128x1xf32>,
    return
  }
  func.func @transform_0(%arg0: i32) -> (i32, i32) {
    %c0_i32 = arith.constant 0 : i32
    %c0_i32_0 = arith.constant 0 : i32
    return %arg0, %c0_i32 : i32, i32
  }
  func.func @transform_1(%arg0: i32) -> (i32, i32) {
    %c0_i32 = arith.constant 0 : i32
    %c0_i32_0 = arith.constant 0 : i32
    %c0_i32_1 = arith.constant 0 : i32
    return %c0_i32, %c0_i32_0 : i32, i32
  }
  func.func @transform_2(%arg0: i32) -> (i32, i32, i32) {
    %c0_i32 = arith.constant 0 : i32
    %c0_i32_0 = arith.constant 0 : i32
    %c0_i32_1 = arith.constant 0 : i32
    %c0_i32_2 = arith.constant 0 : i32
    return %c0_i32, %c0_i32_0, %c0_i32_1 : i32, i32, i32
  }
  func.func @transform_3(%arg0: i32) -> (i32, i32) {
    %c0_i32 = arith.constant 0 : i32
    %c0_i32_0 = arith.constant 0 : i32
    %c0_i32_1 = arith.constant 0 : i32
    return %c0_i32, %c0_i32_0 : i32, i32
  }
  func.func @transform_4(%arg0: i32) -> (i32, i32) {
    %c0_i32 = arith.constant 0 : i32
    %c0_i32_0 = arith.constant 0 : i32
    %c0_i32_1 = arith.constant 0 : i32
    return %c0_i32, %c0_i32_0 : i32, i32
  }
  func.func @transform_5(%arg0: i32) -> (i32, i32) {
    %c0_i32 = arith.constant 0 : i32
    %c0_i32_0 = arith.constant 0 : i32
    return %arg0, %c0_i32 : i32, i32
  }
}

</mosaic_0001>

<bundles_post_ra>
// kernel: pinns_forward.1
= control target key start
LH: loop header
LB: loop body
LE: loop exit
PB: predicated region body
PF: predicated region fallthrough
CT: control target
= control target key end

     0   :  { %s2460_s18 = smov 0   ;;  %s3020_s0 = inlined_call_operand.vmem [shape: f32[256,3], index: 0, kind: input, shape index: {}]   ;;  %s3021_s1 = inlined_call_operand.vmem [shape: f32[8,128], index: 1, kind: input, shape index: {}]   ;;  %s3022_s2 = inlined_call_operand.vmem [shape: bf16[7,128,128], index: 2, kind: input, shape index: {}]   ;;  %s3023_s3 = inlined_call_operand.vmem [shape: f32[1,128], index: 3, kind: input, shape index: {}]   ;;  %s3024_s4 = inlined_call_operand.vmem [shape: f32[9,128], index: 4, kind: input, shape index: {}]   ;;  %s3025_s5 = inlined_call_operand.vmem [shape: f32[256,1], index: 5, kind: output, shape index: {}]  }
   0x1 LB: > { %s1692_s19 = sadd.s32 4294967295, %s2425_s18   ;;  %p1696_p0 = scmp.ge.s32.totalorder %s2425_s18, 1  ;;  %s2425_s18 = sphi %s2460_s18, %s15_s18  }
   0x2   : > { %p188_p1 = scmp.lt.s32.totalorder %s2425_s18, 3 }
   0x4   : > { %p189_p2 = pnand %p1696_p0, %p188_p1 }
   0x5   : > { %s1697_s20 = sshll.u32 (!%p189_p2), %s1692_s19, 4 }
   0x6   : > { %192 = sbr.rel (%p189_p2) target bundleno = 1455 (0x5af), region = 40  ;;  %p217_p3 = scmp.lt.s32.totalorder (!%p189_p2), %s1697_s20, 31 }
   0xb   : > { %v2427_v0 = vmov 1   ;;  %v2428_v1 = vmov 0   ;;  %v2429_v2 = vmov 2   ;;  %s3027_s20 = smov (!%p217_p3, %s1697_s20), 31  ;;  %v2030_v15 = vld [vmem:[%s3022_s2 + $0x38] sm:$0xff]  ;;  %v2029_v16 = vld [vmem:[%s3022_s2 + $0x30] sm:$0xff] }
   0xc   : > { %2115 = vset.pattern.permute.xlu1 %v2427_v0  ;;  %2114 = vset.pattern.permute.xlu0 %v2428_v1  ;;  %s1698_s21 = sshll.u32 %s3027_s20, 3  ;;  %v2028_v18 = vld [vmem:[%s3022_s2 + $0x28] sm:$0xff]  ;;  %v2027_v19 = vld [vmem:[%s3022_s2 + $0x20] sm:$0xff]  ;;  %v2026_v20 = vld [vmem:[%s3022_s2 + $0x18] sm:$0xff]  ;;  %vm1619_vm0 = vcmask 7168  }
   0xd   : > { %2116 = vset.pattern.permute.xlu2 %v2429_v2  ;;  %s2479_s24 = scalar_lea.vmem %s3020_s0, %s1698_s21  ;;  %644 = vmatpush.bf16.msra.mxu0 %v2030_v15  ;;  %v2025_v23 = vld [vmem:[%s3022_s2 + $0x10] sm:$0xff]  ;;  %v2024_v24 = vld [vmem:[%s3022_s2 + $0x8] sm:$0xff]  ;;  %v2023_v27 = vld [vmem:[%s3022_s2] sm:$0xff]  ;;  %s2958_s29 = scalar_lea.vmem %s3025_s5, %s1698_s21 }
   0xe   : > { %v228_v3 = vld [vmem:[%s2479_s24] sm:$0xff]  ;;  %v229_v4 = vld [vmem:[%s2479_s24 + $0x8] sm:$0xff]  ;;  %v230_v5 = vld [vmem:[%s2479_s24 + $0x10] sm:$0xff]  ;;  %2079 = vmatpush.bf16.msra.mxu3 %v2030_v15 }
   0xf   : > { %343 = vperm.xlu1 %2115, %v228_v3   ;;  %247 = vperm.xlu0 %2114, %v228_v3   ;;  %v231_v6 = vld [vmem:[%s2479_s24 + $0x18] sm:$0xff]  ;;  %v232_v7 = vld [vmem:[%s2479_s24 + $0x20] sm:$0xff]  ;;  %v233_v8 = vld [vmem:[%s2479_s24 + $0x28] sm:$0xff] }
  0x10   : > { %440 = vperm.xlu2 %2116, %v228_v3   ;;  %v234_v9 = vld [vmem:[%s2479_s24 + $0x30] sm:$0xff]  ;;  %v235_v10 = vld [vmem:[%s2479_s24 + $0x38] sm:$0xff]  ;;  %v237_v11 = vld [vmem:[%s2479_s24 + $0x48] sm:$0xff] }
  0x11   : > { %v238_v12 = vld [vmem:[%s2479_s24 + $0x50] sm:$0xff]  ;;  %v236_v13 = vld [vmem:[%s2479_s24 + $0x40] sm:$0xff]  ;;  %v239_v14 = vld [vmem:[%s2479_s24 + $0x58] sm:$0xff]  ;;  %645 = vmatpush.bf16.msra.mxu0 %v2029_v16 }
  0x12   : > { %2080 = vmatpush.bf16.msra.mxu3 %v2029_v16  ;;  %v2520_v17 = vld [vmem:[%s2479_s24 + $0x60] sm:$0xff]  ;;  %v241_v21 = vld [vmem:[%s2479_s24 + $0x68] sm:$0xff]  ;;  %v2545_v25 = vld [vmem:[%s2479_s24 + $0x70] sm:$0xff] }
  0x13   : > { %v244_v28 = vld [vmem:[%s3021_s1] sm:$0xff]  ;;  %v243_v54 = vld [vmem:[%s2479_s24 + $0x78] sm:$0xff] }
  0x14   : > { %v2556_v29 = vperm.slane %v244_v28, 1  ;;  %v2558_v30 = vperm.slane %v244_v28, 0  ;;  %v2560_v32 = vperm.slane %v244_v28, 2  ;;  %v2571_v39 = vld [vmem:[%s3024_s4] ss:$0 sm:$0xff] }
  0x15   : > { %646 = vmatpush.bf16.msra.mxu0 %v2028_v18 }
  0x16   : > { %2081 = vmatpush.bf16.msra.mxu3 %v2028_v18 }
  0x17   : > { %347 = vperm.xlu1 %2115, %v229_v4   ;;  %252 = vperm.xlu0 %2114, %v229_v4  }
  0x18   : > { %444 = vperm.xlu2 %2116, %v229_v4  }
  0x19   : > { %647 = vmatpush.bf16.msra.mxu0 %v2027_v19 }
  0x1a   : > { %2082 = vmatpush.bf16.msra.mxu3 %v2027_v19 }
  0x1d   : > { %648 = vmatpush.bf16.msra.mxu0 %v2026_v20 }
  0x1e   : > { %2083 = vmatpush.bf16.msra.mxu3 %v2026_v20 }
  0x1f   : > { %2117 = vset.pattern.permute.xlu1 %v2428_v1  ;;  %257 = vperm.xlu0 %2114, %v230_v5  }
  0x20   : > { %262 = vperm.xlu1 %2117, %v231_v6   ;;  %2118 = vset.pattern.permute.xlu2 %v2427_v0 }
  0x21   : > { %351 = vperm.xlu2 %2118, %v230_v5   ;;  %649 = vmatpush.bf16.msra.mxu0 %v2025_v23 }
  0x22   : > { %2084 = vmatpush.bf16.msra.mxu3 %v2025_v23 }
  0x25   : > { %650 = vmatpush.bf16.msra.mxu0 %v2024_v24 }
  0x26   : > { %2085 = vmatpush.bf16.msra.mxu3 %v2024_v24 }
  0x27   : > { %2119 = vset.pattern.permute.xlu0 %v2427_v0 }
  0x28   : > { %2120 = vset.pattern.permute.xlu1 %v2429_v2  ;;  %355 = vperm.xlu0 %2119, %v231_v6  }
  0x29   : > { %448 = vperm.xlu1 %2120, %v230_v5   ;;  %2121 = vset.pattern.permute.xlu2 %v2429_v2 }
  0x2a   : > { %452 = vperm.xlu2 %2121, %v231_v6   ;;  %651 = vmatpush.bf16.msra.mxu0 %v2023_v27 }
  0x2b   : > { %2086 = vmatpush.bf16.msra.mxu3 %v2023_v27 }
  0x30   : > { %359 = vperm.xlu0 %2119, %v232_v7  }
  0x31   : > { %2122 = vset.pattern.permute.xlu1 %v2428_v1 }
  0x32   : > { %267 = vperm.xlu1 %2122, %v232_v7   ;;  %2123 = vset.pattern.permute.xlu2 %v2428_v1 }
  0x33   : > { %272 = vperm.xlu2 %2123, %v233_v8  }
  0x38   : > { %2126 = vset.pattern.permute.xlu0 %v2429_v2 }
  0x39   : > { %460 = vperm.xlu0 %2126, %v233_v8  }
  0x3a   : > { %2124 = vset.pattern.permute.xlu1 %v2427_v0 }
  0x3b   : > { %363 = vperm.xlu1 %2124, %v233_v8   ;;  %2125 = vset.pattern.permute.xlu2 %v2429_v2 }
  0x3c   : > { %456 = vperm.xlu2 %2125, %v232_v7  }
  0x41   : > { %464 = vperm.xlu0 %2126, %v234_v9  }
  0x43   : > { %2127 = vset.pattern.permute.xlu1 %v2428_v1 }
  0x44   : > { %277 = vperm.xlu1 %2127, %v234_v9   ;;  %2128 = vset.pattern.permute.xlu2 %v2428_v1 }
  0x45   : > { %282 = vperm.xlu2 %2128, %v235_v10  }
  0x49   : > { %2133 = vset.pattern.permute.xlu0 %v2428_v1 }
  0x4a   : > { %292 = vperm.xlu0 %2133, %v237_v11  }
  0x4c   : > { %2129 = vset.pattern.permute.xlu1 %v2427_v0 }
  0x4d   : > { %367 = vperm.xlu1 %2129, %v234_v9   ;;  %2130 = vset.pattern.permute.xlu2 %v2427_v0 }
  0x4e   : > { %371 = vperm.xlu2 %2130, %v235_v10  }
  0x52   : > { %297 = vperm.xlu0 %2133, %v238_v12  }
  0x55   : > { %2131 = vset.pattern.permute.xlu1 %v2429_v2 }
  0x56   : > { %468 = vperm.xlu1 %2131, %v235_v10   ;;  %2132 = vset.pattern.permute.xlu2 %v2428_v1 }
  0x57   : > { %287 = vperm.xlu2 %2132, %v236_v13  }
  0x5a   : > { %2140 = vset.pattern.permute.xlu0 %v2427_v0 }
  0x5b   : > { %387 = vperm.xlu0 %2140, %v239_v14  }
  0x5e   : > { %2134 = vset.pattern.permute.xlu1 %v2427_v0 }
  0x5f   : > { %375 = vperm.xlu1 %2134, %v236_v13   ;;  %2135 = vset.pattern.permute.xlu2 %v2427_v0 }
  0x60   : > { %379 = vperm.xlu2 %2135, %v237_v11  }
  0x63   : > { %391 = vperm.xlu0 %2140, %v2520_v17  }
  0x67   : > { %2136 = vset.pattern.permute.xlu1 %v2429_v2 }
  0x68   : > { %472 = vperm.xlu1 %2136, %v236_v13   ;;  %2137 = vset.pattern.permute.xlu2 %v2429_v2 }
  0x69   : > { %476 = vperm.xlu2 %2137, %v237_v11  }
  0x6a   : > { %v441_v22 = vpop.permute.xlu2 %440 }
  0x6b   : > { %2147 = vset.pattern.permute.xlu0 %v2429_v2  ;;  %v504_v37 = vmul.f32 %v2560_v32, %v441_v22 }
  0x6c   : > { %492 = vperm.xlu0 %2147, %v241_v21  }
  0x70   : > { %2138 = vset.pattern.permute.xlu1 %v2428_v1 }
  0x71   : > { %302 = vperm.xlu1 %2138, %v239_v14   ;;  %2139 = vset.pattern.permute.xlu2 %v2427_v0 }
  0x72   : > { %383 = vperm.xlu2 %2139, %v238_v12   ;;  %v445_v26 = vpop.permute.xlu2 %444 }
  0x73   : > { %v505_v46 = vmul.f32 %v2560_v32, %v445_v26 }
  0x74   : > { %496 = vperm.xlu0 %2147, %v2545_v25  }
  0x79   : > { %2141 = vset.pattern.permute.xlu1 %v2429_v2 }
  0x7a   : > { %480 = vperm.xlu1 %2141, %v238_v12   ;;  %2142 = vset.pattern.permute.xlu2 %v2429_v2 }
  0x7b   : > { %484 = vperm.xlu2 %2142, %v239_v14   ;;  %v352_v31 = vpop.permute.xlu2 %351 }
  0x7c   : > { %v409_v55 = vmul.f32 %v2556_v29, %v352_v31 }
  0x81   : > { %v344_v33 = vpop.permute.xlu1 %343  ;;  %v248_v34 = vpop.permute.xlu0 %247 }
  0x82   : > { %v407_v35 = vmul.f32 %v2556_v29, %v344_v33  ;;  %v326_v36 = vmul.f32 %v2558_v30, %v248_v34  ;;  %2143 = vset.pattern.permute.xlu1 %v2428_v1 }
  0x83   : > { %307 = vperm.xlu1 %2143, %v2520_v17   ;;  %2144 = vset.pattern.permute.xlu2 %v2428_v1 }
  0x84   : > { %312 = vperm.xlu2 %2144, %v241_v21   ;;  %v423_v38 = vadd.f32 %v407_v35, %v326_v36  ;;  %v453_v45 = vpop.permute.xlu2 %452 }
  0x85   : > { %v507_v63 = vmul.f32 %v2560_v32, %v453_v45 }
  0x86   : > { %v520_v40 = vadd.f32 %v504_v37, %v423_v38 }
  0x88   : > { %v538_v48 = vadd.f32 %v2571_v39, %v520_v40 }
  0x89   : > { %v348_v41 = vpop.permute.xlu1 %347  ;;  %v253_v42 = vpop.permute.xlu0 %252 }
  0x8a   : > { %v408_v43 = vmul.f32 %v2556_v29, %v348_v41  ;;  %v327_v44 = vmul.f32 %v2558_v30, %v253_v42  ;;  %2163 = vtanh.f32 %v538_v48 }
  0x8b   : > { %2145 = vset.pattern.permute.xlu1 %v2427_v0 }
  0x8c   : > { %v424_v47 = vadd.f32 %v408_v43, %v327_v44  ;;  %395 = vperm.xlu1 %2145, %v241_v21   ;;  %2146 = vset.pattern.permute.xlu2 %v2429_v2 }
  0x8d   : > { %488 = vperm.xlu2 %2146, %v2520_v17   ;;  %v273_v53 = vpop.permute.xlu2 %272 }
  0x8e   : > { %v521_v49 = vadd.f32 %v505_v46, %v424_v47  ;;  %v331_v23 = vmul.f32 %v2558_v30, %v273_v53 }
  0x90   : > { %v539_v50 = vadd.f32 %v2571_v39, %v521_v49  ;;  %v2164_v57 = vpop.eup %2163 }
  0x91   : > { %v258_v51 = vpop.permute.xlu0 %257 }
  0x92   : > { %2165 = vtanh.f32 %v539_v50  ;;  %v263_v52 = vpop.permute.xlu1 %262  ;;  %v328_v56 = vmul.f32 %v2558_v30, %v258_v51 }
  0x93   : > { %v329_v62 = vmul.f32 %v2558_v30, %v263_v52 }
  0x94   : > { %2148 = vset.pattern.permute.xlu1 %v2428_v1  ;;  %v425_v60 = vadd.f32 %v409_v55, %v328_v56 }
  0x95   : > { %317 = vperm.xlu1 %2148, %v2545_v25   ;;  %2149 = vset.pattern.permute.xlu2 %v2428_v1 }
  0x96   : > { %322 = vperm.xlu2 %2149, %v243_v54   ;;  %v457_v8 = vpop.permute.xlu2 %456 }
  0x97   : > { %v508_v18 = vmul.f32 %v2560_v32, %v457_v8 }
  0x98   : > { %v2166_v58 = vpop.eup %2165 }
  0x99   : > { %v570_v59 = vpack.c.bf16 %v2166_v58, %v2164_v57 }
  0x9a   : > { %v356_v61 = vpop.permute.xlu0 %355 }
  0x9b   : > { %v410_v3 = vmul.f32 %v2556_v29, %v356_v61  ;;  %v449_v4 = vpop.permute.xlu1 %448  ;;  %652 = vmatmul.bf16.vlgmr.msra.gmra.mxu0 %v570_v59 }
  0x9c   : > { %v506_v1 = vmul.f32 %v2560_v32, %v449_v4 }
  0x9d   : > { %v426_v5 = vadd.f32 %v410_v3, %v329_v62  ;;  %2150 = vset.pattern.permute.xlu1 %v2427_v0 }
  0x9e   : > { %v522_v6 = vadd.f32 %v506_v1, %v425_v60  ;;  %399 = vperm.xlu1 %2150, %v2545_v25   ;;  %2151 = vset.pattern.permute.xlu2 %v2427_v0 }
  0x9f   : > { %v523_v7 = vadd.f32 %v507_v63, %v426_v5  ;;  %403 = vperm.xlu2 %2151, %v243_v54   ;;  %v283_v15 = vpop.permute.xlu2 %282 }
  0xa0   : > { %v540_v9 = vadd.f32 %v2571_v39, %v522_v6  ;;  %v333_v45 = vmul.f32 %v2558_v30, %v283_v15 }
  0xa1   : > { %v541_v10 = vadd.f32 %v2571_v39, %v523_v7 }
  0xa2   : > { %2167 = vtanh.f32 %v540_v9  ;;  %v360_v11 = vpop.permute.xlu0 %359 }
  0xa3   : > { %2169 = vtanh.f32 %v541_v10  ;;  %v411_v14 = vmul.f32 %v2556_v29, %v360_v11 }
  0xa4   : > { %v268_v12 = vpop.permute.xlu1 %267 }
  0xa5   : > { %v330_v13 = vmul.f32 %v2558_v30, %v268_v12 }
  0xa6   : > { %2152 = vset.pattern.permute.xlu1 %v2429_v2 }
  0xa7   : > { %500 = vperm.xlu1 %2152, %v243_v54   ;;  %v427_v17 = vadd.f32 %v411_v14, %v330_v13 }
  0xa8   : > { %v2168_v0 = vpop.eup %2167  ;;  %v372_v27 = vpop.permute.xlu2 %371 }
  0xa9   : > { %v2170_v16 = vpop.eup %2169  ;;  %v524_v21 = vadd.f32 %v508_v18, %v427_v17  ;;  %v414_v46 = vmul.f32 %v2556_v29, %v372_v27 }
  0xaa   : > { %v571_v19 = vpack.c.bf16 %v2170_v16, %v2168_v0 }
  0xab   : > { %v461_v20 = vpop.permute.xlu0 %460  ;;  %v542_v2 = vadd.f32 %v2571_v39, %v524_v21  ;;  %v430_v50 = vadd.f32 %v414_v46, %v333_v45 }
  0xac   : > { %657 = vmatmul.bf16.gmra.mxu0 %v571_v19  ;;  %v509_v25 = vmul.f32 %v2560_v32, %v461_v20 }
  0xad   : > { %v364_v22 = vpop.permute.xlu1 %363  ;;  %2171 = vtanh.f32 %v542_v2 }
  0xae   : > { %v412_v24 = vmul.f32 %v2556_v29, %v364_v22 }
  0xb0   : > { %v428_v26 = vadd.f32 %v412_v24, %v331_v23  ;;  %v2038_v23 = vld [vmem:[%s3022_s2 + $0x78] sm:$0xff] }
  0xb1   : > { %v288_v35 = vpop.permute.xlu2 %287  ;;  %784 = vmatpush.bf16.msrb.mxu0 %v2038_v23  ;;  %2087 = vmatpush.bf16.msra.mxu1 %v2038_v23 }
  0xb2   : > { %v525_v28 = vadd.f32 %v509_v25, %v428_v26  ;;  %v334_v6 = vmul.f32 %v2558_v30, %v288_v35  ;;  %v2037_v35 = vld [vmem:[%s3022_s2 + $0x70] sm:$0xff] }
  0xb3   : > { %v2172_v34 = vpop.eup %2171  ;;  %v465_v40 = vpop.permute.xlu0 %464 }
  0xb4   : > { %v543_v31 = vadd.f32 %v2571_v39, %v525_v28  ;;  %v510_v44 = vmul.f32 %v2560_v32, %v465_v40 }
  0xb5   : > { %785 = vmatpush.bf16.msrb.mxu0 %v2037_v35  ;;  %2088 = vmatpush.bf16.msra.mxu1 %v2037_v35 }
  0xb6   : > { %2173 = vtanh.f32 %v543_v31  ;;  %v278_v33 = vpop.permute.xlu1 %277 }
  0xb7   : > { %v332_v41 = vmul.f32 %v2558_v30, %v278_v33 }
  0xba   : > { %v380_v47 = vpop.permute.xlu2 %379 }
  0xbb   : > { %v416_v56 = vmul.f32 %v2556_v29, %v380_v47 }
  0xbc   : > { %v2174_v36 = vpop.eup %2173  ;;  %v293_v54 = vpop.permute.xlu0 %292 }
  0xbd   : > { %v572_v37 = vpack.c.bf16 %v2174_v36, %v2172_v34  ;;  %v335_v57 = vmul.f32 %v2558_v30, %v293_v54 }
  0xbf   : > { %v368_v38 = vpop.permute.xlu1 %367  ;;  %662 = vmatmul.bf16.vlgmr.msra.gmra.mxu3 %v572_v37  ;;  %v432_v60 = vadd.f32 %v416_v56, %v335_v57  ;;  %v2033_v57 = vld [vmem:[%s3022_s2 + $0x50] sm:$0xff] }
  0xc0   : > { %v413_v42 = vmul.f32 %v2556_v29, %v368_v38  ;;  %v2036_v38 = vld [vmem:[%s3022_s2 + $0x68] sm:$0xff] }
  0xc1   : > { %786 = vmatpush.bf16.msrb.mxu0 %v2036_v38  ;;  %2089 = vmatpush.bf16.msra.mxu1 %v2036_v38 }
  0xc2   : > { %v429_v43 = vadd.f32 %v413_v42, %v332_v41 }
  0xc3   : > { %v477_v58 = vpop.permute.xlu2 %476 }
  0xc4   : > { %v526_v48 = vadd.f32 %v510_v44, %v429_v43  ;;  %v513_v61 = vmul.f32 %v2560_v32, %v477_v58  ;;  %v298_v3 = vpop.permute.xlu0 %297  ;;  %v2035_v44 = vld [vmem:[%s3022_s2 + $0x60] sm:$0xff] }
  0xc5   : > { %v336_v24 = vmul.f32 %v2558_v30, %v298_v3  ;;  %787 = vmatpush.bf16.msrb.mxu0 %v2035_v44  ;;  %2090 = vmatpush.bf16.msra.mxu1 %v2035_v44  ;;  %v2031_v3 = vld [vmem:[%s3022_s2 + $0x40] sm:$0xff] }
  0xc6   : > { %v544_v52 = vadd.f32 %v2571_v39, %v526_v48  ;;  %v529_v5 = vadd.f32 %v513_v61, %v432_v60  ;;  %v2032_v61 = vld [vmem:[%s3022_s2 + $0x48] sm:$0xff] }
  0xc8   : > { %v469_v49 = vpop.permute.xlu1 %468  ;;  %2175 = vtanh.f32 %v544_v52  ;;  %v547_v10 = vadd.f32 %v2571_v39, %v529_v5 }
  0xc9   : > { %v511_v51 = vmul.f32 %v2560_v32, %v469_v49 }
  0xcb   : > { %v527_v53 = vadd.f32 %v511_v51, %v430_v50  ;;  %v2034_v50 = vld [vmem:[%s3022_s2 + $0x58] sm:$0xff] }
  0xcc   : > { %v384_v7 = vpop.permute.xlu2 %383  ;;  %788 = vmatpush.bf16.msrb.mxu0 %v2034_v50  ;;  %2091 = vmatpush.bf16.msra.mxu1 %v2034_v50 }
  0xcd   : > { %v545_v55 = vadd.f32 %v2571_v39, %v527_v53  ;;  %v388_v14 = vpop.permute.xlu0 %387  ;;  %v417_v25 = vmul.f32 %v2556_v29, %v384_v7 }
  0xce   : > { %v2176_v62 = vpop.eup %2175  ;;  %v418_v15 = vmul.f32 %v2556_v29, %v388_v14 }
  0xcf   : > { %2177 = vtanh.f32 %v545_v55  ;;  %v433_v27 = vadd.f32 %v417_v25, %v336_v24 }
  0xd0   : > { %2179 = vtanh.f32 %v547_v10  ;;  %789 = vmatpush.bf16.msrb.mxu0 %v2033_v57  ;;  %2092 = vmatpush.bf16.msra.mxu1 %v2033_v57  ;;  %v2046_v57 = vld [vmem:[%s3022_s2 + $0xb8] sm:$0xff] }
  0xd1   : > { %v376_v59 = vpop.permute.xlu1 %375  ;;  %2095 = vmatpush.bf16.msra.mxu2 %v2046_v57 }
  0xd2   : > { %v415_v1 = vmul.f32 %v2556_v29, %v376_v59 }
  0xd4   : > { %v431_v9 = vadd.f32 %v415_v1, %v334_v6  ;;  %790 = vmatpush.bf16.msrb.mxu0 %v2032_v61  ;;  %2093 = vmatpush.bf16.msra.mxu1 %v2032_v61 }
  0xd5   : > { %v2178_v63 = vpop.eup %2177  ;;  %v485_v16 = vpop.permute.xlu2 %484 }
  0xd6   : > { %v573_v4 = vpack.c.bf16 %v2178_v63, %v2176_v62  ;;  %v2180_v18 = vpop.eup %2179  ;;  %v515_v20 = vmul.f32 %v2560_v32, %v485_v16  ;;  %v392_v37 = vpop.permute.xlu0 %391 }
  0xd7   : > { %v419_v42 = vmul.f32 %v2556_v29, %v392_v37 }
  0xd8   : > { %667 = vmatmul.bf16.gmra.mxu3 %v573_v4  ;;  %791 = vmatpush.bf16.msrb.mxu0 %v2031_v3 }
  0xd9   : > { %2094 = vmatpush.bf16.msra.mxu1 %v2031_v3 }
  0xda   : > { %v473_v8 = vpop.permute.xlu1 %472 }
  0xdb   : > { %v512_v11 = vmul.f32 %v2560_v32, %v473_v8 }
  0xdc   : > { %924 = vmatpush.bf16.msra.mxu0 %v2046_v57 }
  0xdd   : > { %v528_v12 = vadd.f32 %v512_v11, %v431_v9 }
  0xde   : > { %v313_v31 = vpop.permute.xlu2 %312  ;;  %v493_v51 = vpop.permute.xlu0 %492 }
  0xdf   : > { %v546_v13 = vadd.f32 %v2571_v39, %v528_v12  ;;  %v339_v54 = vmul.f32 %v2558_v30, %v313_v31  ;;  %v517_v56 = vmul.f32 %v2560_v32, %v493_v51 }
  0xe1   : > { %2181 = vtanh.f32 %v546_v13 }
  0xe3   : > { %v303_v0 = vpop.permute.xlu1 %302 }
  0xe4   : > { %v337_v17 = vmul.f32 %v2558_v30, %v303_v0 }
  0xe6   : > { %v434_v19 = vadd.f32 %v418_v15, %v337_v17  ;;  %v497_v10 = vpop.permute.xlu0 %496 }
  0xe7   : > { %v2182_v21 = vpop.eup %2181  ;;  %v489_v43 = vpop.permute.xlu2 %488  ;;  %v518_v13 = vmul.f32 %v2560_v32, %v497_v10 }
  0xe8   : > { %v574_v22 = vpack.c.bf16 %v2180_v18, %v2182_v21  ;;  %v531_v26 = vadd.f32 %v515_v20, %v434_v19  ;;  %v516_v48 = vmul.f32 %v2560_v32, %v489_v43  ;;  %v2669_v19 = vld [vmem:[%s3024_s4 + $0x1] ss:$0 sm:$0xff] }
  0xea   : > { %672 = vmatmul.bf16.gmra.mxu3 %v574_v22  ;;  %v549_v33 = vadd.f32 %v2571_v39, %v531_v26 }
  0xec   : > { %v481_v2 = vpop.permute.xlu1 %480  ;;  %2183 = vtanh.f32 %v549_v33 }
  0xed   : > { %v514_v28 = vmul.f32 %v2560_v32, %v481_v2 }
  0xef   : > { %v530_v34 = vadd.f32 %v514_v28, %v433_v27 }
  0xf0   : > { %v323_v4 = vpop.permute.xlu2 %322 }
  0xf1   : > { %v548_v36 = vadd.f32 %v2571_v39, %v530_v34  ;;  %v341_v14 = vmul.f32 %v2558_v30, %v323_v4 }
  0xf2   : > { %v2184_v45 = vpop.eup %2183 }
  0xf3   : > { %2185 = vtanh.f32 %v548_v36 }
  0xf5   : > { %v308_v40 = vpop.permute.xlu1 %307 }
  0xf6   : > { %v338_v41 = vmul.f32 %v2558_v30, %v308_v40 }
  0xf8   : > { %v435_v47 = vadd.f32 %v419_v42, %v338_v41 }
  0xf9   : > { %v2186_v46 = vpop.eup %2185  ;;  %v404_v11 = vpop.permute.xlu2 %403 }
  0xfa   : > { %v575_v49 = vpack.c.bf16 %v2184_v45, %v2186_v46  ;;  %v532_v52 = vadd.f32 %v516_v48, %v435_v47  ;;  %v422_v15 = vmul.f32 %v2556_v29, %v404_v11 }
  0xfc   : > { %677 = vmatmul.bf16.gmra.mxu3 %v575_v49  ;;  %v550_v59 = vadd.f32 %v2571_v39, %v532_v52  ;;  %v438_v18 = vadd.f32 %v422_v15, %v341_v14 }
  0xfe   : > { %v396_v53 = vpop.permute.xlu1 %395  ;;  %2187 = vtanh.f32 %v550_v59 }
  0xff   : > { %v420_v55 = vmul.f32 %v2556_v29, %v396_v53 }
 0x101   : > { %v436_v58 = vadd.f32 %v420_v55, %v339_v54 }
 0x103   : > { %v533_v60 = vadd.f32 %v517_v56, %v436_v58 }
 0x104   : > { %v2188_v1 = vpop.eup %2187 }
 0x105   : > { %v551_v62 = vadd.f32 %v2571_v39, %v533_v60  ;;  %v2045_v60 = vld [vmem:[%s3022_s2 + $0xb0] sm:$0xff] }
 0x106   : > { %925 = vmatpush.bf16.msra.mxu0 %v2045_v60  ;;  %2096 = vmatpush.bf16.msra.mxu2 %v2045_v60 }
 0x107   : > { %2189 = vtanh.f32 %v551_v62  ;;  %v318_v63 = vpop.permute.xlu1 %317 }
 0x108   : > { %v340_v8 = vmul.f32 %v2558_v30, %v318_v63  ;;  %v2044_v63 = vld [vmem:[%s3022_s2 + $0xa8] sm:$0xff] }
 0x10a   : > { %926 = vmatpush.bf16.msra.mxu0 %v2044_v63  ;;  %2097 = vmatpush.bf16.msra.mxu2 %v2044_v63 }
 0x10d   : > { %v2190_v5 = vpop.eup %2189 }
 0x10e   : > { %v576_v6 = vpack.c.bf16 %v2190_v5, %v2188_v1  ;;  %v2043_v5 = vld [vmem:[%s3022_s2 + $0xa0] sm:$0xff] }
 0x10f   : > { %927 = vmatpush.bf16.msra.mxu0 %v2043_v5  ;;  %2098 = vmatpush.bf16.msra.mxu2 %v2043_v5 }
 0x110   : > { %v400_v7 = vpop.permute.xlu1 %399  ;;  %682 = vmatmul.bf16.gmra.mxu3 %v576_v6  ;;  %v2042_v6 = vld [vmem:[%s3022_s2 + $0x98] sm:$0xff] }
 0x111   : > { %v421_v9 = vmul.f32 %v2556_v29, %v400_v7 }
 0x113   : > { %v437_v12 = vadd.f32 %v421_v9, %v340_v8  ;;  %928 = vmatpush.bf16.msra.mxu0 %v2042_v6  ;;  %2099 = vmatpush.bf16.msra.mxu2 %v2042_v6  ;;  %v2041_v9 = vld [vmem:[%s3022_s2 + $0x90] sm:$0xff]  ;;  %v2051_v6 = vld [vmem:[%s3022_s2 + $0xe0] sm:$0xff] }
 0x115   : > { %v534_v0 = vadd.f32 %v518_v13, %v437_v12  ;;  %v2040_v12 = vld [vmem:[%s3022_s2 + $0x88] sm:$0xff]  ;;  %v2039_v13 = vld [vmem:[%s3022_s2 + $0x80] sm:$0xff] }
 0x117   : > { %v552_v21 = vadd.f32 %v2571_v39, %v534_v0  ;;  %929 = vmatpush.bf16.msra.mxu0 %v2041_v9  ;;  %2100 = vmatpush.bf16.msra.mxu2 %v2041_v9 }
 0x118   : > { %v653_v16 = vpop.f32.mrf.mxu0 }
 0x119   : > { %v501_v17 = vpop.permute.xlu1 %500  ;;  %v654_v23 = vadd.f32 %v2669_v19, %v653_v16  ;;  %2191 = vtanh.f32 %v552_v21  ;;  %v2715_v21 = vld [vmem:[%s3024_s4 + $0x2] ss:$0 sm:$0xff] }
 0x11a   : > { %v519_v20 = vmul.f32 %v2560_v32, %v501_v17 }
 0x11b   : > { %930 = vmatpush.bf16.msra.mxu0 %v2040_v12  ;;  %2101 = vmatpush.bf16.msra.mxu2 %v2040_v12 }
 0x11c   : > { %v535_v22 = vadd.f32 %v519_v20, %v438_v18 }
 0x11e   : > { %v553_v30 = vadd.f32 %v2571_v39, %v535_v22 }
 0x11f   : > { %v2192_v25 = vpop.eup %2191  ;;  %931 = vmatpush.bf16.msra.mxu0 %v2039_v13  ;;  %2102 = vmatpush.bf16.msra.mxu2 %v2039_v13  ;;  %v2048_v13 = vld [vmem:[%s3022_s2 + $0xc8] sm:$0xff] }
 0x120   : > { %2193 = vtanh.f32 %v553_v30  ;;  %v655_v29 = vpop.f32.mrf.mxu0 }
 0x121   : > { %v656_v24 = vadd.f32 %v2669_v19, %v655_v29  ;;  %2195 = vtanh.f32 %v654_v23 }
 0x123   : > { %2197 = vtanh.f32 %v656_v24 }
 0x126   : > { %v2194_v26 = vpop.eup %2193 }
 0x127   : > { %v577_v2 = vpack.c.bf16 %v2194_v26, %v2192_v25  ;;  %v2196_v27 = vpop.eup %2195 }
 0x129   : > { %v2198_v28 = vpop.eup %2197  ;;  %v658_v32 = vpop.f32.mrf.mxu0  ;;  %687 = vmatmul.bf16.gmra.mxu3 %v577_v2 }
 0x12a   : > { %v709_v31 = vpack.c.bf16 %v2198_v28, %v2196_v27  ;;  %v659_v33 = vadd.f32 %v2669_v19, %v658_v32 }
 0x12c   : > { %792 = vmatmul.bf16.vlgmr.msrb.gmra.mxu0 %v709_v31  ;;  %2199 = vtanh.f32 %v659_v33 }
 0x131   : > { %v660_v34 = vpop.f32.mrf.mxu0 }
 0x132   : > { %v661_v39 = vadd.f32 %v2669_v19, %v660_v34  ;;  %v2200_v35 = vpop.eup %2199 }
 0x134   : > { %2201 = vtanh.f32 %v661_v39 }
 0x13a   : > { %v2202_v36 = vpop.eup %2201 }
 0x13b   : > { %v710_v37 = vpack.c.bf16 %v2202_v36, %v2200_v35 }
 0x13d   : > { %797 = vmatmul.bf16.gmra.mxu0 %v710_v37 }
 0x142   : > { %v663_v38 = vpop.f32.mrf.mxu3 }
 0x143   : > { %v664_v40 = vadd.f32 %v2669_v19, %v663_v38 }
 0x145   : > { %2203 = vtanh.f32 %v664_v40 }
 0x14a   : > { %v665_v41 = vpop.f32.mrf.mxu3 }
 0x14b   : > { %v666_v42 = vadd.f32 %v2669_v19, %v665_v41  ;;  %v2204_v43 = vpop.eup %2203 }
 0x14d   : > { %2205 = vtanh.f32 %v666_v42 }
 0x153   : > { %v2206_v44 = vpop.eup %2205 }
 0x154   : > { %v711_v45 = vpack.c.bf16 %v2206_v44, %v2204_v43 }
 0x156   : > { %802 = vmatmul.bf16.vlgmr.msra.gmra.mxu1 %v711_v45 }
 0x15b   : > { %v668_v46 = vpop.f32.mrf.mxu3 }
 0x15c   : > { %v669_v47 = vadd.f32 %v2669_v19, %v668_v46 }
 0x15e   : > { %2207 = vtanh.f32 %v669_v47 }
 0x163   : > { %v670_v48 = vpop.f32.mrf.mxu3 }
 0x164   : > { %v671_v49 = vadd.f32 %v2669_v19, %v670_v48  ;;  %v2208_v50 = vpop.eup %2207 }
 0x166   : > { %2209 = vtanh.f32 %v671_v49 }
 0x16c   : > { %v2210_v51 = vpop.eup %2209 }
 0x16d   : > { %v673_v52 = vpop.f32.mrf.mxu3  ;;  %v712_v53 = vpack.c.bf16 %v2210_v51, %v2208_v50  ;;  %v2054_v51 = vld [vmem:[%s3022_s2 + $0xf8] sm:$0xff] }
 0x16e   : > { %v674_v54 = vadd.f32 %v2669_v19, %v673_v52  ;;  %1064 = vmatpush.bf16.msrb.mxu3 %v2054_v51 }
 0x16f   : > { %807 = vmatmul.bf16.gmra.mxu1 %v712_v53 }
 0x170   : > { %2211 = vtanh.f32 %v674_v54 }
 0x175   : > { %v675_v55 = vpop.f32.mrf.mxu3 }
 0x176   : > { %v676_v56 = vadd.f32 %v2669_v19, %v675_v55  ;;  %v2212_v58 = vpop.eup %2211 }
 0x178   : > { %2213 = vtanh.f32 %v676_v56 }
 0x17e   : > { %v2214_v59 = vpop.eup %2213 }
 0x17f   : > { %v678_v61 = vpop.f32.mrf.mxu3  ;;  %v713_v62 = vpack.c.bf16 %v2214_v59, %v2212_v58  ;;  %v2053_v59 = vld [vmem:[%s3022_s2 + $0xf0] sm:$0xff] }
 0x180   : > { %v679_v3 = vadd.f32 %v2669_v19, %v678_v61  ;;  %1065 = vmatpush.bf16.msrb.mxu3 %v2053_v59  ;;  %v2062_v59 = vld [vmem:[%s3022_s2 + $0x138] sm:$0xff] }
 0x181   : > { %812 = vmatmul.bf16.gmra.mxu1 %v713_v62  ;;  %v2052_v62 = vld [vmem:[%s3022_s2 + $0xe8] sm:$0xff]  ;;  %1204 = vmatpush.bf16.msrb.mxu0 %v2062_v59 }
 0x182   : > { %2215 = vtanh.f32 %v679_v3 }
 0x184   : > { %1066 = vmatpush.bf16.msrb.mxu3 %v2052_v62  ;;  %v2061_v62 = vld [vmem:[%s3022_s2 + $0x130] sm:$0xff] }
 0x185   : > { %1205 = vmatpush.bf16.msrb.mxu0 %v2061_v62  ;;  %v2068_v62 = vld [vmem:[%s3022_s2 + $0x168] sm:$0xff] }
 0x187   : > { %v680_v4 = vpop.f32.mrf.mxu3 }
 0x188   : > { %v681_v1 = vadd.f32 %v2669_v19, %v680_v4  ;;  %v2216_v7 = vpop.eup %2215  ;;  %1067 = vmatpush.bf16.msrb.mxu3 %v2051_v6 }
 0x18a   : > { %2217 = vtanh.f32 %v681_v1 }
 0x190   : > { %v2218_v8 = vpop.eup %2217 }
 0x191   : > { %v714_v10 = vpack.c.bf16 %v2218_v8, %v2216_v7  ;;  %v2050_v7 = vld [vmem:[%s3022_s2 + $0xd8] sm:$0xff] }
 0x192   : > { %1068 = vmatpush.bf16.msrb.mxu3 %v2050_v7  ;;  %v2059_v7 = vld [vmem:[%s3022_s2 + $0x120] sm:$0xff] }
 0x193   : > { %v683_v11 = vpop.f32.mrf.mxu3  ;;  %817 = vmatmul.bf16.gmra.mxu1 %v714_v10  ;;  %v2049_v10 = vld [vmem:[%s3022_s2 + $0xd0] sm:$0xff] }
 0x194   : > { %v684_v14 = vadd.f32 %v2669_v19, %v683_v11 }
 0x196   : > { %2219 = vtanh.f32 %v684_v14  ;;  %1069 = vmatpush.bf16.msrb.mxu3 %v2049_v10  ;;  %v2047_v14 = vld [vmem:[%s3022_s2 + $0xc0] sm:$0xff] }
 0x19a   : > { %1070 = vmatpush.bf16.msrb.mxu3 %v2048_v13 }
 0x19b   : > { %v685_v15 = vpop.f32.mrf.mxu3 }
 0x19c   : > { %v686_v0 = vadd.f32 %v2669_v19, %v685_v15  ;;  %v2220_v16 = vpop.eup %2219 }
 0x19e   : > { %2221 = vtanh.f32 %v686_v0  ;;  %1071 = vmatpush.bf16.msrb.mxu3 %v2047_v14  ;;  %v2056_v14 = vld [vmem:[%s3022_s2 + $0x108] sm:$0xff] }
 0x1a4   : > { %v2222_v17 = vpop.eup %2221 }
 0x1a5   : > { %v715_v18 = vpack.c.bf16 %v2222_v17, %v2220_v16 }
 0x1a7   : > { %822 = vmatmul.bf16.gmra.mxu1 %v715_v18 }
 0x1a9   : > { %v793_v20 = vpop.f32.mrf.mxu0 }
 0x1aa   : > { %v794_v23 = vadd.f32 %v2715_v21, %v793_v20 }
 0x1ac   : > { %v688_v22 = vpop.f32.mrf.mxu3  ;;  %2223 = vtanh.f32 %v794_v23  ;;  %v2760_v23 = vld [vmem:[%s3024_s4 + $0x3] ss:$0 sm:$0xff] }
 0x1ad   : > { %v689_v29 = vadd.f32 %v2669_v19, %v688_v22 }
 0x1b1   : > { %v795_v30 = vpop.f32.mrf.mxu0 }
 0x1b2   : > { %v796_v24 = vadd.f32 %v2715_v21, %v795_v30  ;;  %v2224_v2 = vpop.eup %2223 }
 0x1b4   : > { %2225 = vtanh.f32 %v796_v24  ;;  %v690_v25 = vpop.f32.mrf.mxu3 }
 0x1b5   : > { %v691_v26 = vadd.f32 %v2669_v19, %v690_v25  ;;  %2227 = vtanh.f32 %v689_v29 }
 0x1b7   : > { %2229 = vtanh.f32 %v691_v26 }
 0x1ba   : > { %v2226_v27 = vpop.eup %2225  ;;  %v798_v28 = vpop.f32.mrf.mxu0 }
 0x1bb   : > { %v849_v32 = vpack.c.bf16 %v2226_v27, %v2224_v2  ;;  %v2228_v31 = vpop.eup %2227  ;;  %v799_v39 = vadd.f32 %v2715_v21, %v798_v28 }
 0x1bd   : > { %v2230_v33 = vpop.eup %2229  ;;  %932 = vmatmul.bf16.vlgmr.msra.gmra.mxu0 %v849_v32  ;;  %2231 = vtanh.f32 %v799_v39 }
 0x1be   : > { %v716_v34 = vpack.c.bf16 %v2230_v33, %v2228_v31 }
 0x1c0   : > { %827 = vmatmul.bf16.gmra.mxu1 %v716_v34 }
 0x1c2   : > { %v800_v35 = vpop.f32.mrf.mxu0 }
 0x1c3   : > { %v801_v36 = vadd.f32 %v2715_v21, %v800_v35  ;;  %v2232_v37 = vpop.eup %2231 }
 0x1c5   : > { %2233 = vtanh.f32 %v801_v36 }
 0x1cb   : > { %v2234_v19 = vpop.eup %2233 }
 0x1cc   : > { %v850_v38 = vpack.c.bf16 %v2234_v19, %v2232_v37 }
 0x1ce   : > { %937 = vmatmul.bf16.gmra.mxu0 %v850_v38 }
 0x1d3   : > { %v803_v40 = vpop.f32.mrf.mxu1 }
 0x1d4   : > { %v804_v41 = vadd.f32 %v2715_v21, %v803_v40 }
 0x1d6   : > { %2235 = vtanh.f32 %v804_v41 }
 0x1db   : > { %v805_v42 = vpop.f32.mrf.mxu1 }
 0x1dc   : > { %v806_v43 = vadd.f32 %v2715_v21, %v805_v42  ;;  %v2236_v44 = vpop.eup %2235 }
 0x1de   : > { %2237 = vtanh.f32 %v806_v43 }
 0x1e4   : > { %v2238_v45 = vpop.eup %2237 }
 0x1e5   : > { %v851_v46 = vpack.c.bf16 %v2238_v45, %v2236_v44 }
 0x1e7   : > { %942 = vmatmul.bf16.vlgmr.msra.gmra.mxu2 %v851_v46 }
 0x1ec   : > { %v808_v47 = vpop.f32.mrf.mxu1 }
 0x1ed   : > { %v809_v48 = vadd.f32 %v2715_v21, %v808_v47 }
 0x1ef   : > { %2239 = vtanh.f32 %v809_v48 }
 0x1f4   : > { %v810_v49 = vpop.f32.mrf.mxu1 }
 0x1f5   : > { %v811_v50 = vadd.f32 %v2715_v21, %v810_v49  ;;  %v2240_v52 = vpop.eup %2239 }
 0x1f7   : > { %2241 = vtanh.f32 %v811_v50 }
 0x1fd   : > { %v2242_v53 = vpop.eup %2241 }
 0x1fe   : > { %v813_v54 = vpop.f32.mrf.mxu1  ;;  %v852_v55 = vpack.c.bf16 %v2242_v53, %v2240_v52 }
 0x1ff   : > { %v814_v56 = vadd.f32 %v2715_v21, %v813_v54 }
 0x200   : > { %947 = vmatmul.bf16.gmra.mxu2 %v852_v55 }
 0x201   : > { %2243 = vtanh.f32 %v814_v56 }
 0x206   : > { %v815_v57 = vpop.f32.mrf.mxu1 }
 0x207   : > { %v816_v58 = vadd.f32 %v2715_v21, %v815_v57  ;;  %v2244_v60 = vpop.eup %2243 }
 0x209   : > { %2245 = vtanh.f32 %v816_v58 }
 0x20f   : > { %v2246_v61 = vpop.eup %2245 }
 0x210   : > { %v818_v63 = vpop.f32.mrf.mxu1  ;;  %v853_v3 = vpack.c.bf16 %v2246_v61, %v2244_v60 }
 0x211   : > { %v819_v4 = vadd.f32 %v2715_v21, %v818_v63 }
 0x212   : > { %952 = vmatmul.bf16.gmra.mxu2 %v853_v3 }
 0x213   : > { %2247 = vtanh.f32 %v819_v4  ;;  %v2060_v4 = vld [vmem:[%s3022_s2 + $0x128] sm:$0xff] }
 0x214   : > { %1206 = vmatpush.bf16.msrb.mxu0 %v2060_v4 }
 0x218   : > { %v820_v1 = vpop.f32.mrf.mxu1  ;;  %1207 = vmatpush.bf16.msrb.mxu0 %v2059_v7  ;;  %v2066_v7 = vld [vmem:[%s3022_s2 + $0x158] sm:$0xff] }
 0x219   : > { %v821_v5 = vadd.f32 %v2715_v21, %v820_v1  ;;  %v2248_v8 = vpop.eup %2247 }
 0x21b   : > { %2249 = vtanh.f32 %v821_v5 }
 0x221   : > { %v2250_v9 = vpop.eup %2249 }
 0x222   : > { %v854_v11 = vpack.c.bf16 %v2250_v9, %v2248_v8  ;;  %v2058_v8 = vld [vmem:[%s3022_s2 + $0x118] sm:$0xff] }
 0x223   : > { %1208 = vmatpush.bf16.msrb.mxu0 %v2058_v8 }
 0x224   : > { %v823_v12 = vpop.f32.mrf.mxu1  ;;  %957 = vmatmul.bf16.gmra.mxu2 %v854_v11  ;;  %v2057_v11 = vld [vmem:[%s3022_s2 + $0x110] sm:$0xff] }
 0x225   : > { %v824_v15 = vadd.f32 %v2715_v21, %v823_v12 }
 0x227   : > { %2251 = vtanh.f32 %v824_v15  ;;  %1209 = vmatpush.bf16.msrb.mxu0 %v2057_v11  ;;  %v2055_v15 = vld [vmem:[%s3022_s2 + $0x100] sm:$0xff]  ;;  %v2064_v11 = vld [vmem:[%s3022_s2 + $0x148] sm:$0xff] }
 0x22b   : > { %1210 = vmatpush.bf16.msrb.mxu0 %v2056_v14 }
 0x22c   : > { %v825_v0 = vpop.f32.mrf.mxu1 }
 0x22d   : > { %v826_v16 = vadd.f32 %v2715_v21, %v825_v0  ;;  %v2252_v17 = vpop.eup %2251 }
 0x22f   : > { %2253 = vtanh.f32 %v826_v16  ;;  %1211 = vmatpush.bf16.msrb.mxu0 %v2055_v15 }
 0x235   : > { %v2254_v18 = vpop.eup %2253 }
 0x236   : > { %v855_v20 = vpack.c.bf16 %v2254_v18, %v2252_v17 }
 0x238   : > { %962 = vmatmul.bf16.gmra.mxu2 %v855_v20 }
 0x23a   : > { %v933_v22 = vpop.f32.mrf.mxu0 }
 0x23b   : > { %v934_v29 = vadd.f32 %v2760_v23, %v933_v22 }
 0x23d   : > { %v828_v30 = vpop.f32.mrf.mxu1  ;;  %2255 = vtanh.f32 %v934_v29  ;;  %v2805_v29 = vld [vmem:[%s3024_s4 + $0x4] ss:$0 sm:$0xff] }
 0x23e   : > { %v829_v25 = vadd.f32 %v2715_v21, %v828_v30 }
 0x242   : > { %v935_v24 = vpop.f32.mrf.mxu0 }
 0x243   : > { %v936_v26 = vadd.f32 %v2760_v23, %v935_v24  ;;  %v2256_v28 = vpop.eup %2255 }
 0x245   : > { %2257 = vtanh.f32 %v936_v26  ;;  %v830_v2 = vpop.f32.mrf.mxu1 }
 0x246   : > { %v831_v27 = vadd.f32 %v2715_v21, %v830_v2  ;;  %2259 = vtanh.f32 %v829_v25 }
 0x248   : > { %2261 = vtanh.f32 %v831_v27 }
 0x24b   : > { %v2258_v32 = vpop.eup %2257  ;;  %v938_v31 = vpop.f32.mrf.mxu0 }
 0x24c   : > { %v989_v33 = vpack.c.bf16 %v2258_v32, %v2256_v28  ;;  %v2260_v34 = vpop.eup %2259  ;;  %v939_v36 = vadd.f32 %v2760_v23, %v938_v31 }
 0x24e   : > { %v2262_v39 = vpop.eup %2261  ;;  %1072 = vmatmul.bf16.vlgmr.msrb.gmra.mxu3 %v989_v33  ;;  %2263 = vtanh.f32 %v939_v36 }
 0x24f   : > { %v856_v35 = vpack.c.bf16 %v2262_v39, %v2260_v34 }
 0x251   : > { %967 = vmatmul.bf16.gmra.mxu2 %v856_v35 }
 0x253   : > { %v940_v37 = vpop.f32.mrf.mxu0 }
 0x254   : > { %v941_v19 = vadd.f32 %v2760_v23, %v940_v37  ;;  %v2264_v38 = vpop.eup %2263 }
 0x256   : > { %2265 = vtanh.f32 %v941_v19 }
 0x25c   : > { %v2266_v21 = vpop.eup %2265 }
 0x25d   : > { %v990_v40 = vpack.c.bf16 %v2266_v21, %v2264_v38 }
 0x25f   : > { %1077 = vmatmul.bf16.gmra.mxu3 %v990_v40 }
 0x26a   : > { %v943_v41 = vpop.f32.mrf.mxu2 }
 0x26b   : > { %v944_v42 = vadd.f32 %v2760_v23, %v943_v41 }
 0x26d   : > { %2267 = vtanh.f32 %v944_v42 }
 0x272   : > { %v945_v43 = vpop.f32.mrf.mxu2 }
 0x273   : > { %v946_v44 = vadd.f32 %v2760_v23, %v945_v43  ;;  %v2268_v45 = vpop.eup %2267 }
 0x275   : > { %2269 = vtanh.f32 %v946_v44 }
 0x27b   : > { %v2270_v46 = vpop.eup %2269 }
 0x27c   : > { %v991_v47 = vpack.c.bf16 %v2270_v46, %v2268_v45 }
 0x27e   : > { %1082 = vmatmul.bf16.gmra.mxu3 %v991_v47 }
 0x283   : > { %v948_v48 = vpop.f32.mrf.mxu2 }
 0x284   : > { %v949_v49 = vadd.f32 %v2760_v23, %v948_v48 }
 0x286   : > { %2271 = vtanh.f32 %v949_v49 }
 0x28b   : > { %v950_v50 = vpop.f32.mrf.mxu2 }
 0x28c   : > { %v951_v51 = vadd.f32 %v2760_v23, %v950_v50  ;;  %v2272_v52 = vpop.eup %2271 }
 0x28e   : > { %2273 = vtanh.f32 %v951_v51  ;;  %v2070_v51 = vld [vmem:[%s3022_s2 + $0x178] sm:$0xff] }
 0x28f   : > { %1344 = vmatpush.bf16.msrb.mxu1 %v2070_v51 }
 0x294   : > { %v2274_v53 = vpop.eup %2273 }
 0x295   : > { %v953_v54 = vpop.f32.mrf.mxu2  ;;  %v992_v55 = vpack.c.bf16 %v2274_v53, %v2272_v52 }
 0x296   : > { %v954_v56 = vadd.f32 %v2760_v23, %v953_v54  ;;  %v2069_v54 = vld [vmem:[%s3022_s2 + $0x170] sm:$0xff] }
 0x297   : > { %1087 = vmatmul.bf16.gmra.mxu3 %v992_v55  ;;  %1345 = vmatpush.bf16.msrb.mxu1 %v2069_v54 }
 0x298   : > { %2275 = vtanh.f32 %v954_v56 }
 0x29b   : > { %1346 = vmatpush.bf16.msrb.mxu1 %v2068_v62 }
 0x29d   : > { %v955_v57 = vpop.f32.mrf.mxu2 }
 0x29e   : > { %v956_v58 = vadd.f32 %v2760_v23, %v955_v57  ;;  %v2276_v60 = vpop.eup %2275 }
 0x2a0   : > { %2277 = vtanh.f32 %v956_v58 }
 0x2a6   : > { %v2278_v61 = vpop.eup %2277 }
 0x2a7   : > { %v958_v63 = vpop.f32.mrf.mxu2  ;;  %v993_v3 = vpack.c.bf16 %v2278_v61, %v2276_v60 }
 0x2a8   : > { %v959_v1 = vadd.f32 %v2760_v23, %v958_v63 }
 0x2a9   : > { %1092 = vmatmul.bf16.gmra.mxu3 %v993_v3 }
 0x2aa   : > { %2279 = vtanh.f32 %v959_v1 }
 0x2af   : > { %v960_v5 = vpop.f32.mrf.mxu2 }
 0x2b0   : > { %v961_v6 = vadd.f32 %v2760_v23, %v960_v5  ;;  %v2280_v9 = vpop.eup %2279  ;;  %v2067_v5 = vld [vmem:[%s3022_s2 + $0x160] sm:$0xff] }
 0x2b1   : > { %1347 = vmatpush.bf16.msrb.mxu1 %v2067_v5 }
 0x2b2   : > { %2281 = vtanh.f32 %v961_v6 }
 0x2b5   : > { %1348 = vmatpush.bf16.msrb.mxu1 %v2066_v7 }
 0x2b8   : > { %v2282_v10 = vpop.eup %2281 }
 0x2b9   : > { %v994_v12 = vpack.c.bf16 %v2282_v10, %v2280_v9  ;;  %v2065_v10 = vld [vmem:[%s3022_s2 + $0x150] sm:$0xff] }
 0x2ba   : > { %1349 = vmatpush.bf16.msrb.mxu1 %v2065_v10 }
 0x2bb   : > { %v963_v13 = vpop.f32.mrf.mxu2  ;;  %1097 = vmatmul.bf16.gmra.mxu3 %v994_v12 }
 0x2bc   : > { %v964_v0 = vadd.f32 %v2760_v23, %v963_v13 }
 0x2be   : > { %2283 = vtanh.f32 %v964_v0  ;;  %1350 = vmatpush.bf16.msrb.mxu1 %v2064_v11  ;;  %v2063_v0 = vld [vmem:[%s3022_s2 + $0x140] sm:$0xff]  ;;  %v2073_v11 = vld [vmem:[%s3022_s2 + $0x190] sm:$0xff] }
 0x2c2   : > { %1351 = vmatpush.bf16.msrb.mxu1 %v2063_v0 }
 0x2c3   : > { %v965_v16 = vpop.f32.mrf.mxu2 }
 0x2c4   : > { %v966_v17 = vadd.f32 %v2760_v23, %v965_v16  ;;  %v2284_v18 = vpop.eup %2283 }
 0x2c6   : > { %2285 = vtanh.f32 %v966_v17 }
 0x2cc   : > { %v2286_v20 = vpop.eup %2285 }
 0x2cd   : > { %v995_v22 = vpack.c.bf16 %v2286_v20, %v2284_v18 }
 0x2cf   : > { %1102 = vmatmul.bf16.gmra.mxu3 %v995_v22 }
 0x2d1   : > { %v1073_v30 = vpop.f32.mrf.mxu3 }
 0x2d2   : > { %v1074_v25 = vadd.f32 %v2805_v29, %v1073_v30 }
 0x2d4   : > { %v968_v24 = vpop.f32.mrf.mxu2  ;;  %2287 = vtanh.f32 %v1074_v25 }
 0x2d5   : > { %v969_v2 = vadd.f32 %v2760_v23, %v968_v24  ;;  %v2850_v24 = vld [vmem:[%s3024_s4 + $0x5] ss:$0 sm:$0xff] }
 0x2d9   : > { %v1075_v26 = vpop.f32.mrf.mxu3 }
 0x2da   : > { %v1076_v27 = vadd.f32 %v2805_v29, %v1075_v26  ;;  %v2288_v31 = vpop.eup %2287 }
 0x2dc   : > { %2289 = vtanh.f32 %v1076_v27  ;;  %v970_v28 = vpop.f32.mrf.mxu2 }
 0x2dd   : > { %v971_v32 = vadd.f32 %v2760_v23, %v970_v28  ;;  %2291 = vtanh.f32 %v969_v2 }
 0x2df   : > { %2293 = vtanh.f32 %v971_v32 }
 0x2e2   : > { %v2290_v33 = vpop.eup %2289  ;;  %v1078_v34 = vpop.f32.mrf.mxu3 }
 0x2e3   : > { %v1129_v39 = vpack.c.bf16 %v2290_v33, %v2288_v31  ;;  %v2292_v35 = vpop.eup %2291  ;;  %v1079_v19 = vadd.f32 %v2805_v29, %v1078_v34 }
 0x2e5   : > { %v2294_v36 = vpop.eup %2293  ;;  %1212 = vmatmul.bf16.vlgmr.msrb.gmra.mxu0 %v1129_v39  ;;  %2295 = vtanh.f32 %v1079_v19 }
 0x2e6   : > { %v996_v37 = vpack.c.bf16 %v2294_v36, %v2292_v35 }
 0x2e8   : > { %1107 = vmatmul.bf16.gmra.mxu3 %v996_v37 }
 0x2ea   : > { %v1080_v38 = vpop.f32.mrf.mxu3 }
 0x2eb   : > { %v1081_v21 = vadd.f32 %v2805_v29, %v1080_v38  ;;  %v2296_v40 = vpop.eup %2295 }
 0x2ed   : > { %2297 = vtanh.f32 %v1081_v21 }
 0x2f3   : > { %v2298_v23 = vpop.eup %2297 }
 0x2f4   : > { %v1130_v41 = vpack.c.bf16 %v2298_v23, %v2296_v40 }
 0x2f6   : > { %1217 = vmatmul.bf16.gmra.mxu0 %v1130_v41 }
 0x301   : > { %v1083_v42 = vpop.f32.mrf.mxu3 }
 0x302   : > { %v1084_v43 = vadd.f32 %v2805_v29, %v1083_v42 }
 0x304   : > { %2299 = vtanh.f32 %v1084_v43 }
 0x309   : > { %v1085_v44 = vpop.f32.mrf.mxu3 }
 0x30a   : > { %v1086_v45 = vadd.f32 %v2805_v29, %v1085_v44  ;;  %v2300_v46 = vpop.eup %2299 }
 0x30c   : > { %2301 = vtanh.f32 %v1086_v45 }
 0x312   : > { %v2302_v47 = vpop.eup %2301 }
 0x313   : > { %v1131_v48 = vpack.c.bf16 %v2302_v47, %v2300_v46 }
 0x315   : > { %1222 = vmatmul.bf16.gmra.mxu0 %v1131_v48 }
 0x31a   : > { %v1088_v49 = vpop.f32.mrf.mxu3 }
 0x31b   : > { %v1089_v50 = vadd.f32 %v2805_v29, %v1088_v49 }
 0x31d   : > { %2303 = vtanh.f32 %v1089_v50 }
 0x322   : > { %v1090_v52 = vpop.f32.mrf.mxu3 }
 0x323   : > { %v1091_v53 = vadd.f32 %v2805_v29, %v1090_v52  ;;  %v2304_v55 = vpop.eup %2303  ;;  %v2078_v52 = vld [vmem:[%s3022_s2 + $0x1b8] sm:$0xff] }
 0x324   : > { %1484 = vmatpush.bf16.msrb.mxu2 %v2078_v52 }
 0x325   : > { %2305 = vtanh.f32 %v1091_v53 }
 0x32b   : > { %v2306_v56 = vpop.eup %2305 }
 0x32c   : > { %v1093_v57 = vpop.f32.mrf.mxu3  ;;  %v1132_v58 = vpack.c.bf16 %v2306_v56, %v2304_v55  ;;  %v2077_v55 = vld [vmem:[%s3022_s2 + $0x1b0] sm:$0xff] }
 0x32d   : > { %v1094_v59 = vadd.f32 %v2805_v29, %v1093_v57  ;;  %1485 = vmatpush.bf16.msrb.mxu2 %v2077_v55 }
 0x32e   : > { %1227 = vmatmul.bf16.gmra.mxu0 %v1132_v58 }
 0x32f   : > { %2307 = vtanh.f32 %v1094_v59 }
 0x334   : > { %v1095_v60 = vpop.f32.mrf.mxu3 }
 0x335   : > { %v1096_v61 = vadd.f32 %v2805_v29, %v1095_v60  ;;  %v2308_v63 = vpop.eup %2307 }
 0x337   : > { %2309 = vtanh.f32 %v1096_v61 }
 0x33d   : > { %v2310_v3 = vpop.eup %2309 }
 0x33e   : > { %v1098_v4 = vpop.f32.mrf.mxu3  ;;  %v1133_v1 = vpack.c.bf16 %v2310_v3, %v2308_v63  ;;  %v2076_v63 = vld [vmem:[%s3022_s2 + $0x1a8] sm:$0xff] }
 0x33f   : > { %v1099_v6 = vadd.f32 %v2805_v29, %v1098_v4  ;;  %1486 = vmatpush.bf16.msrb.mxu2 %v2076_v63 }
 0x340   : > { %1232 = vmatmul.bf16.gmra.mxu0 %v1133_v1 }
 0x341   : > { %2311 = vtanh.f32 %v1099_v6  ;;  %v2075_v6 = vld [vmem:[%s3022_s2 + $0x1a0] sm:$0xff] }
 0x343   : > { %1487 = vmatpush.bf16.msrb.mxu2 %v2075_v6 }
 0x346   : > { %v1100_v8 = vpop.f32.mrf.mxu3 }
 0x347   : > { %v1101_v9 = vadd.f32 %v2805_v29, %v1100_v8  ;;  %v2312_v12 = vpop.eup %2311 }
 0x349   : > { %2313 = vtanh.f32 %v1101_v9  ;;  %v2074_v9 = vld [vmem:[%s3022_s2 + $0x198] sm:$0xff] }
 0x34a   : > { %1488 = vmatpush.bf16.msrb.mxu2 %v2074_v9 }
 0x34e   : > { %1489 = vmatpush.bf16.msrb.mxu2 %v2073_v11 }
 0x34f   : > { %v2314_v13 = vpop.eup %2313 }
 0x350   : > { %v1134_v14 = vpack.c.bf16 %v2314_v13, %v2312_v12  ;;  %v2072_v13 = vld [vmem:[%s3022_s2 + $0x188] sm:$0xff] }
 0x352   : > { %v1103_v15 = vpop.f32.mrf.mxu3  ;;  %1237 = vmatmul.bf16.gmra.mxu0 %v1134_v14  ;;  %1490 = vmatpush.bf16.msrb.mxu2 %v2072_v13 }
 0x353   : > { %v1104_v16 = vadd.f32 %v2805_v29, %v1103_v15 }
 0x355   : > { %2315 = vtanh.f32 %v1104_v16  ;;  %v2071_v16 = vld [vmem:[%s3022_s2 + $0x180] sm:$0xff] }
 0x356   : > { %1491 = vmatpush.bf16.msrb.mxu2 %v2071_v16  ;;  %v2916_v16 = vld [vmem:[%s3024_s4 + $0x7] ss:$0 sm:$0xff] }
 0x35a   : > { %v1105_v17 = vpop.f32.mrf.mxu3 }
 0x35b   : > { %v1106_v18 = vadd.f32 %v2805_v29, %v1105_v17  ;;  %v2316_v20 = vpop.eup %2315 }
 0x35d   : > { %2317 = vtanh.f32 %v1106_v18 }
 0x362   : > { %v1213_v22 = vpop.f32.mrf.mxu0 }
 0x363   : > { %v2318_v30 = vpop.eup %2317  ;;  %v1214_v26 = vadd.f32 %v2850_v24, %v1213_v22 }
 0x364   : > { %v1135_v25 = vpack.c.bf16 %v2318_v30, %v2316_v20 }
 0x365   : > { %2319 = vtanh.f32 %v1214_v26  ;;  %v2895_v26 = vld [vmem:[%s3024_s4 + $0x6] ss:$0 sm:$0xff] }
 0x366   : > { %1242 = vmatmul.bf16.gmra.mxu0 %v1135_v25 }
 0x36a   : > { %v1215_v2 = vpop.f32.mrf.mxu0 }
 0x36b   : > { %v1216_v27 = vadd.f32 %v2850_v24, %v1215_v2  ;;  %v1108_v28 = vpop.f32.mrf.mxu3  ;;  %v2320_v31 = vpop.eup %2319 }
 0x36c   : > { %v1109_v32 = vadd.f32 %v2805_v29, %v1108_v28 }
 0x36d   : > { %2321 = vtanh.f32 %v1216_v27 }
 0x36e   : > { %2323 = vtanh.f32 %v1109_v32 }
 0x373   : > { %v2322_v33 = vpop.eup %2321  ;;  %v1110_v34 = vpop.f32.mrf.mxu3 }
 0x374   : > { %v1218_v39 = vpop.f32.mrf.mxu0  ;;  %v1111_v35 = vadd.f32 %v2805_v29, %v1110_v34  ;;  %v1269_v36 = vpack.c.bf16 %v2322_v33, %v2320_v31  ;;  %v2324_v19 = vpop.eup %2323 }
 0x375   : > { %v1219_v37 = vadd.f32 %v2850_v24, %v1218_v39 }
 0x376   : > { %2325 = vtanh.f32 %v1111_v35  ;;  %1352 = vmatmul.bf16.vlgmr.msrb.gmra.mxu1 %v1269_v36 }
 0x377   : > { %2327 = vtanh.f32 %v1219_v37 }
 0x37c   : > { %v1220_v38 = vpop.f32.mrf.mxu0  ;;  %v2326_v21 = vpop.eup %2325 }
 0x37d   : > { %v1221_v40 = vadd.f32 %v2850_v24, %v1220_v38  ;;  %v1136_v23 = vpack.c.bf16 %v2326_v21, %v2324_v19  ;;  %v2328_v41 = vpop.eup %2327 }
 0x37f   : > { %2329 = vtanh.f32 %v1221_v40  ;;  %1247 = vmatmul.bf16.gmra.mxu0 %v1136_v23 }
 0x385   : > { %v2330_v42 = vpop.eup %2329 }
 0x386   : > { %v1270_v43 = vpack.c.bf16 %v2330_v42, %v2328_v41 }
 0x388   : > { %1357 = vmatmul.bf16.gmra.mxu1 %v1270_v43 }
 0x392   : > { %v1223_v29 = vpop.f32.mrf.mxu0 }
 0x393   : > { %v1224_v44 = vadd.f32 %v2850_v24, %v1223_v29 }
 0x395   : > { %2331 = vtanh.f32 %v1224_v44 }
 0x39a   : > { %v1225_v45 = vpop.f32.mrf.mxu0 }
 0x39b   : > { %v1226_v46 = vadd.f32 %v2850_v24, %v1225_v45  ;;  %v2332_v47 = vpop.eup %2331 }
 0x39d   : > { %2333 = vtanh.f32 %v1226_v46 }
 0x3a3   : > { %v2334_v48 = vpop.eup %2333 }
 0x3a4   : > { %v1271_v49 = vpack.c.bf16 %v2334_v48, %v2332_v47 }
 0x3a6   : > { %1362 = vmatmul.bf16.gmra.mxu1 %v1271_v49 }
 0x3ab   : > { %v1228_v50 = vpop.f32.mrf.mxu0 }
 0x3ac   : > { %v1229_v51 = vadd.f32 %v2850_v24, %v1228_v50 }
 0x3ae   : > { %2335 = vtanh.f32 %v1229_v51 }
 0x3b3   : > { %v1230_v53 = vpop.f32.mrf.mxu0 }
 0x3b4   : > { %v1231_v54 = vadd.f32 %v2850_v24, %v1230_v53  ;;  %v2336_v56 = vpop.eup %2335 }
 0x3b6   : > { %2337 = vtanh.f32 %v1231_v54 }
 0x3bc   : > { %v2338_v57 = vpop.eup %2337 }
 0x3bd   : > { %v1233_v58 = vpop.f32.mrf.mxu0  ;;  %v1272_v59 = vpack.c.bf16 %v2338_v57, %v2336_v56 }
 0x3be   : > { %v1234_v60 = vadd.f32 %v2850_v24, %v1233_v58 }
 0x3bf   : > { %1367 = vmatmul.bf16.gmra.mxu1 %v1272_v59 }
 0x3c0   : > { %2339 = vtanh.f32 %v1234_v60 }
 0x3c5   : > { %v1235_v61 = vpop.f32.mrf.mxu0 }
 0x3c6   : > { %v1236_v62 = vadd.f32 %v2850_v24, %v1235_v61  ;;  %v2340_v3 = vpop.eup %2339 }
 0x3c8   : > { %2341 = vtanh.f32 %v1236_v62 }
 0x3ce   : > { %v2342_v4 = vpop.eup %2341 }
 0x3cf   : > { %v1238_v1 = vpop.f32.mrf.mxu0  ;;  %v1273_v5 = vpack.c.bf16 %v2342_v4, %v2340_v3 }
 0x3d0   : > { %v1239_v7 = vadd.f32 %v2850_v24, %v1238_v1 }
 0x3d1   : > { %1372 = vmatmul.bf16.gmra.mxu1 %v1273_v5 }
 0x3d2   : > { %2343 = vtanh.f32 %v1239_v7 }
 0x3d7   : > { %v1240_v8 = vpop.f32.mrf.mxu0 }
 0x3d8   : > { %v1241_v10 = vadd.f32 %v2850_v24, %v1240_v8  ;;  %v2344_v12 = vpop.eup %2343 }
 0x3da   : > { %2345 = vtanh.f32 %v1241_v10 }
 0x3e0   : > { %v2346_v14 = vpop.eup %2345 }
 0x3e1   : > { %v1274_v15 = vpack.c.bf16 %v2346_v14, %v2344_v12 }
 0x3e3   : > { %v1243_v0 = vpop.f32.mrf.mxu0  ;;  %1377 = vmatmul.bf16.gmra.mxu1 %v1274_v15 }
 0x3e4   : > { %v1244_v17 = vadd.f32 %v2850_v24, %v1243_v0 }
 0x3e6   : > { %2347 = vtanh.f32 %v1244_v17 }
 0x3eb   : > { %v1245_v18 = vpop.f32.mrf.mxu0 }
 0x3ec   : > { %v1246_v20 = vadd.f32 %v2850_v24, %v1245_v18  ;;  %v2348_v22 = vpop.eup %2347 }
 0x3ee   : > { %2349 = vtanh.f32 %v1246_v20 }
 0x3f3   : > { %v1353_v30 = vpop.f32.mrf.mxu1 }
 0x3f4   : > { %v2350_v25 = vpop.eup %2349  ;;  %v1354_v27 = vadd.f32 %v2895_v26, %v1353_v30 }
 0x3f5   : > { %v1275_v2 = vpack.c.bf16 %v2350_v25, %v2348_v22  ;;  %v2922_v22 = vld [vmem:[%s3023_s3] ss:$0 sm:$0xff] }
 0x3f6   : > { %2351 = vtanh.f32 %v1354_v27 }
 0x3f7   : > { %1382 = vmatmul.bf16.gmra.mxu1 %v1275_v2 }
 0x3fb   : > { %v1355_v28 = vpop.f32.mrf.mxu1 }
 0x3fc   : > { %v1356_v32 = vadd.f32 %v2895_v26, %v1355_v28  ;;  %v1248_v31 = vpop.f32.mrf.mxu0  ;;  %v2352_v34 = vpop.eup %2351 }
 0x3fd   : > { %v1249_v33 = vadd.f32 %v2850_v24, %v1248_v31 }
 0x3fe   : > { %2353 = vtanh.f32 %v1356_v32 }
 0x3ff   : > { %2355 = vtanh.f32 %v1249_v33 }
 0x404   : > { %v2354_v39 = vpop.eup %2353  ;;  %v1250_v35 = vpop.f32.mrf.mxu0 }
 0x405   : > { %v1358_v36 = vpop.f32.mrf.mxu1  ;;  %v1251_v37 = vadd.f32 %v2850_v24, %v1250_v35  ;;  %v1409_v19 = vpack.c.bf16 %v2354_v39, %v2352_v34  ;;  %v2356_v21 = vpop.eup %2355 }
 0x406   : > { %v1359_v38 = vadd.f32 %v2895_v26, %v1358_v36 }
 0x407   : > { %2357 = vtanh.f32 %v1251_v37  ;;  %1492 = vmatmul.bf16.vlgmr.msrb.gmra.mxu2 %v1409_v19 }
 0x408   : > { %2359 = vtanh.f32 %v1359_v38 }
 0x40d   : > { %v1360_v40 = vpop.f32.mrf.mxu1  ;;  %v2358_v23 = vpop.eup %2357 }
 0x40e   : > { %v1361_v41 = vadd.f32 %v2895_v26, %v1360_v40  ;;  %v1276_v42 = vpack.c.bf16 %v2358_v23, %v2356_v21  ;;  %v2360_v43 = vpop.eup %2359 }
 0x410   : > { %2361 = vtanh.f32 %v1361_v41  ;;  %1387 = vmatmul.bf16.gmra.mxu1 %v1276_v42 }
 0x416   : > { %v2362_v29 = vpop.eup %2361 }
 0x417   : > { %v1410_v44 = vpack.c.bf16 %v2362_v29, %v2360_v43 }
 0x419   : > { %1497 = vmatmul.bf16.gmra.mxu2 %v1410_v44 }
 0x423   : > { %v1363_v24 = vpop.f32.mrf.mxu1 }
 0x424   : > { %v1364_v45 = vadd.f32 %v2895_v26, %v1363_v24 }
 0x426   : > { %2363 = vtanh.f32 %v1364_v45 }
 0x42b   : > { %v1365_v46 = vpop.f32.mrf.mxu1 }
 0x42c   : > { %v1366_v47 = vadd.f32 %v2895_v26, %v1365_v46  ;;  %v2364_v48 = vpop.eup %2363 }
 0x42e   : > { %2365 = vtanh.f32 %v1366_v47 }
 0x434   : > { %v2366_v49 = vpop.eup %2365 }
 0x435   : > { %v1411_v50 = vpack.c.bf16 %v2366_v49, %v2364_v48 }
 0x437   : > { %1502 = vmatmul.bf16.gmra.mxu2 %v1411_v50 }
 0x43c   : > { %v1368_v51 = vpop.f32.mrf.mxu1 }
 0x43d   : > { %v1369_v52 = vadd.f32 %v2895_v26, %v1368_v51 }
 0x43f   : > { %2367 = vtanh.f32 %v1369_v52 }
 0x444   : > { %v1370_v53 = vpop.f32.mrf.mxu1 }
 0x445   : > { %v1371_v54 = vadd.f32 %v2895_v26, %v1370_v53  ;;  %v2368_v55 = vpop.eup %2367 }
 0x447   : > { %2369 = vtanh.f32 %v1371_v54 }
 0x44d   : > { %v2370_v56 = vpop.eup %2369 }
 0x44e   : > { %v1373_v57 = vpop.f32.mrf.mxu1  ;;  %v1412_v58 = vpack.c.bf16 %v2370_v56, %v2368_v55 }
 0x44f   : > { %v1374_v59 = vadd.f32 %v2895_v26, %v1373_v57 }
 0x450   : > { %1507 = vmatmul.bf16.gmra.mxu2 %v1412_v58 }
 0x451   : > { %2371 = vtanh.f32 %v1374_v59 }
 0x456   : > { %v1375_v60 = vpop.f32.mrf.mxu1 }
 0x457   : > { %v1376_v61 = vadd.f32 %v2895_v26, %v1375_v60  ;;  %v2372_v62 = vpop.eup %2371 }
 0x459   : > { %2373 = vtanh.f32 %v1376_v61 }
 0x45f   : > { %v2374_v63 = vpop.eup %2373 }
 0x460   : > { %v1378_v3 = vpop.f32.mrf.mxu1  ;;  %v1413_v4 = vpack.c.bf16 %v2374_v63, %v2372_v62 }
 0x461   : > { %v1379_v1 = vadd.f32 %v2895_v26, %v1378_v3 }
 0x462   : > { %1512 = vmatmul.bf16.gmra.mxu2 %v1413_v4 }
 0x463   : > { %2375 = vtanh.f32 %v1379_v1 }
 0x468   : > { %v1380_v5 = vpop.f32.mrf.mxu1 }
 0x469   : > { %v1381_v6 = vadd.f32 %v2895_v26, %v1380_v5  ;;  %v2376_v7 = vpop.eup %2375 }
 0x46b   : > { %2377 = vtanh.f32 %v1381_v6 }
 0x471   : > { %v2378_v8 = vpop.eup %2377 }
 0x472   : > { %v1414_v9 = vpack.c.bf16 %v2378_v8, %v2376_v7  ;;  %v2951_v8 = vld [vmem:[%s3024_s4 + $0x8] ss:$0 sm:$0xff] }
 0x474   : > { %v1383_v10 = vpop.f32.mrf.mxu1  ;;  %1517 = vmatmul.bf16.gmra.mxu2 %v1414_v9 }
 0x475   : > { %v1384_v11 = vadd.f32 %v2895_v26, %v1383_v10 }
 0x477   : > { %2379 = vtanh.f32 %v1384_v11 }
 0x47c   : > { %v1385_v12 = vpop.f32.mrf.mxu1 }
 0x47d   : > { %v1386_v13 = vadd.f32 %v2895_v26, %v1385_v12  ;;  %v2380_v14 = vpop.eup %2379 }
 0x47f   : > { %2381 = vtanh.f32 %v1386_v13 }
 0x485   : > { %v2382_v15 = vpop.eup %2381 }
 0x486   : > { %v1415_v0 = vpack.c.bf16 %v2382_v15, %v2380_v14 }
 0x488   : > { %1522 = vmatmul.bf16.gmra.mxu2 %v1415_v0 }
 0x48a   : > { %v1493_v17 = vpop.f32.mrf.mxu2 }
 0x48b   : > { %v1494_v18 = vadd.f32 %v2916_v16, %v1493_v17 }
 0x48d   : > { %2383 = vtanh.f32 %v1494_v18  ;;  %v1388_v20 = vpop.f32.mrf.mxu1 }
 0x48e   : > { %v1389_v2 = vadd.f32 %v2895_v26, %v1388_v20 }
 0x492   : > { %v1495_v30 = vpop.f32.mrf.mxu2 }
 0x493   : > { %v2384_v25 = vpop.eup %2383  ;;  %v1496_v27 = vadd.f32 %v2916_v16, %v1495_v30 }
 0x494   : > { %v1553_v28 = vmul.f32 %v2384_v25, %v2922_v22 }
 0x495   : > { %2385 = vtanh.f32 %v1496_v27  ;;  %v1390_v32 = vpop.f32.mrf.mxu1 }
 0x496   : > { %v1391_v31 = vadd.f32 %v2895_v26, %v1390_v32  ;;  %1569 = vadd.xlane.f32.xlu2 %v1553_v28  ;;  %2387 = vtanh.f32 %v1389_v2 }
 0x498   : > { %2389 = vtanh.f32 %v1391_v31 }
 0x49b   : > { %v2386_v33 = vpop.eup %2385 }
 0x49c   : > { %v1498_v34 = vpop.f32.mrf.mxu2  ;;  %v1554_v35 = vmul.f32 %v2386_v33, %v2922_v22  ;;  %v2388_v36 = vpop.eup %2387 }
 0x49d   : > { %v1499_v39 = vadd.f32 %v2916_v16, %v1498_v34 }
 0x49e   : > { %v2390_v37 = vpop.eup %2389  ;;  %1571 = vadd.xlane.f32.xlu0 %v1554_v35 }
 0x49f   : > { %2391 = vtanh.f32 %v1499_v39  ;;  %v1416_v19 = vpack.c.bf16 %v2390_v37, %v2388_v36 }
 0x4a1   : > { %1527 = vmatmul.bf16.gmra.mxu2 %v1416_v19 }
 0x4a4   : > { %v1500_v38 = vpop.f32.mrf.mxu2 }
 0x4a5   : > { %v2392_v21 = vpop.eup %2391  ;;  %v1501_v40 = vadd.f32 %v2916_v16, %v1500_v38 }
 0x4a6   : > { %v1555_v26 = vmul.f32 %v2392_v21, %v2922_v22 }
 0x4a7   : > { %2393 = vtanh.f32 %v1501_v40 }
 0x4a8   : > { %1573 = vadd.xlane.f32.xlu1 %v1555_v26 }
 0x4ad   : > { %v2394_v23 = vpop.eup %2393 }
 0x4ae   : > { %v1556_v41 = vmul.f32 %v2394_v23, %v2922_v22 }
 0x4b0   : > { %1575 = vadd.xlane.f32.xlu2 %v1556_v41 }
 0x4ba   : > { %v1503_v42 = vpop.f32.mrf.mxu2 }
 0x4bb   : > { %v1504_v43 = vadd.f32 %v2916_v16, %v1503_v42 }
 0x4bd   : > { %2395 = vtanh.f32 %v1504_v43 }
 0x4c2   : > { %v1505_v29 = vpop.f32.mrf.mxu2 }
 0x4c3   : > { %v2396_v44 = vpop.eup %2395  ;;  %v1506_v24 = vadd.f32 %v2916_v16, %v1505_v29 }
 0x4c4   : > { %v1557_v45 = vmul.f32 %v2396_v44, %v2922_v22 }
 0x4c5   : > { %2397 = vtanh.f32 %v1506_v24 }
 0x4c6   : > { %1577 = vadd.xlane.f32.xlu2 %v1557_v45 }
 0x4cb   : > { %v2398_v46 = vpop.eup %2397 }
 0x4cc   : > { %v1558_v47 = vmul.f32 %v2398_v46, %v2922_v22 }
 0x4ce   : > { %1579 = vadd.xlane.f32.xlu0 %v1558_v47 }
 0x4d3   : > { %v1508_v48 = vpop.f32.mrf.mxu2 }
 0x4d4   : > { %v1509_v49 = vadd.f32 %v2916_v16, %v1508_v48 }
 0x4d6   : > { %2399 = vtanh.f32 %v1509_v49 }
 0x4db   : > { %v1510_v50 = vpop.f32.mrf.mxu2 }
 0x4dc   : > { %v2400_v51 = vpop.eup %2399  ;;  %v1511_v52 = vadd.f32 %v2916_v16, %v1510_v50 }
 0x4dd   : > { %v1559_v53 = vmul.f32 %v2400_v51, %v2922_v22 }
 0x4de   : > { %2401 = vtanh.f32 %v1511_v52 }
 0x4df   : > { %1581 = vadd.xlane.f32.xlu1 %v1559_v53 }
 0x4e4   : > { %v2402_v54 = vpop.eup %2401 }
 0x4e5   : > { %v1513_v55 = vpop.f32.mrf.mxu2  ;;  %v1560_v56 = vmul.f32 %v2402_v54, %v2922_v22 }
 0x4e6   : > { %v1514_v57 = vadd.f32 %v2916_v16, %v1513_v55 }
 0x4e7   : > { %1583 = vadd.xlane.f32.xlu2 %v1560_v56 }
 0x4e8   : > { %2403 = vtanh.f32 %v1514_v57 }
 0x4ed   : > { %v1515_v58 = vpop.f32.mrf.mxu2 }
 0x4ee   : > { %v2404_v59 = vpop.eup %2403  ;;  %v1516_v60 = vadd.f32 %v2916_v16, %v1515_v58 }
 0x4ef   : > { %v1561_v61 = vmul.f32 %v2404_v59, %v2922_v22 }
 0x4f0   : > { %2405 = vtanh.f32 %v1516_v60 }
 0x4f1   : > { %1585 = vadd.xlane.f32.xlu0 %v1561_v61 }
 0x4f6   : > { %v2406_v62 = vpop.eup %2405 }
 0x4f7   : > { %v1518_v63 = vpop.f32.mrf.mxu2  ;;  %v1562_v3 = vmul.f32 %v2406_v62, %v2922_v22 }
 0x4f8   : > { %v1519_v4 = vadd.f32 %v2916_v16, %v1518_v63 }
 0x4f9   : > { %1587 = vadd.xlane.f32.xlu1 %v1562_v3 }
 0x4fa   : > { %2407 = vtanh.f32 %v1519_v4 }
 0x4ff   : > { %v1520_v1 = vpop.f32.mrf.mxu2 }
 0x500   : > { %v2408_v5 = vpop.eup %2407  ;;  %v1521_v6 = vadd.f32 %v2916_v16, %v1520_v1 }
 0x501   : > { %v1563_v7 = vmul.f32 %v2408_v5, %v2922_v22 }
 0x502   : > { %2409 = vtanh.f32 %v1521_v6 }
 0x503   : > { %1589 = vadd.xlane.f32.xlu2 %v1563_v7 }
 0x508   : > { %v2410_v9 = vpop.eup %2409 }
 0x509   : > { %v1570_v10 = vpop.xlane.xlu2 %1569  ;;  %v1564_v11 = vmul.f32 %v2410_v9, %v2922_v22 }
 0x50a   : > { %v1603_v12 = vadd.f32 %v2951_v8, %v1570_v10 }
 0x50b   : > { %v1523_v13 = vpop.f32.mrf.mxu2  ;;  %1591 = vadd.xlane.f32.xlu0 %v1564_v11 }
 0x50c   : > { %1620 = vst.msk [vmem:[%s2958_s29] sm:$0xff] %vm1619_vm0, %v1603_v12  ;;  %v1524_v14 = vadd.f32 %v2916_v16, %v1523_v13 }
 0x50e   : > { %2411 = vtanh.f32 %v1524_v14 }
 0x511   : > { %v1572_v15 = vpop.xlane.xlu0 %1571 }
 0x512   : > { %v1604_v0 = vadd.f32 %v2951_v8, %v1572_v15 }
 0x513   : > { %v1525_v17 = vpop.f32.mrf.mxu2 }
 0x514   : > { %v2412_v18 = vpop.eup %2411  ;;  %1621 = vst.msk [vmem:[%s2958_s29 + $0x8] sm:$0xff] %vm1619_vm0, %v1604_v0  ;;  %v1526_v20 = vadd.f32 %v2916_v16, %v1525_v17 }
 0x515   : > { %v1565_v30 = vmul.f32 %v2412_v18, %v2922_v22 }
 0x516   : > { %2413 = vtanh.f32 %v1526_v20 }
 0x517   : > { %1593 = vadd.xlane.f32.xlu1 %v1565_v30 }
 0x51b   : > { %v1574_v25 = vpop.xlane.xlu1 %1573 }
 0x51c   : > { %v1605_v2 = vadd.f32 %v2951_v8, %v1574_v25  ;;  %v2414_v27 = vpop.eup %2413 }
 0x51d   : > { %v1566_v28 = vmul.f32 %v2414_v27, %v2922_v22 }
 0x51e   : > { %1622 = vst.msk [vmem:[%s2958_s29 + $0x10] sm:$0xff] %vm1619_vm0, %v1605_v2 }
 0x51f   : > { %1595 = vadd.xlane.f32.xlu2 %v1566_v28 }
 0x523   : > { %v1576_v32 = vpop.xlane.xlu2 %1575 }
 0x524   : > { %v1606_v31 = vadd.f32 %v2951_v8, %v1576_v32  ;;  %v1528_v33 = vpop.f32.mrf.mxu2 }
 0x525   : > { %v1529_v34 = vadd.f32 %v2916_v16, %v1528_v33 }
 0x526   : > { %1623 = vst.msk [vmem:[%s2958_s29 + $0x18] sm:$0xff] %vm1619_vm0, %v1606_v31 }
 0x527   : > { %2415 = vtanh.f32 %v1529_v34 }
 0x52c   : > { %v1530_v39 = vpop.f32.mrf.mxu2 }
 0x52d   : > { %v2416_v35 = vpop.eup %2415  ;;  %v1531_v36 = vadd.f32 %v2916_v16, %v1530_v39 }
 0x52e   : > { %v1567_v37 = vmul.f32 %v2416_v35, %v2922_v22 }
 0x52f   : > { %2417 = vtanh.f32 %v1531_v36 }
 0x530   : > { %1597 = vadd.xlane.f32.xlu0 %v1567_v37 }
 0x535   : > { %v2418_v19 = vpop.eup %2417 }
 0x536   : > { %v1568_v38 = vmul.f32 %v2418_v19, %v2922_v22 }
 0x538   : > { %1599 = vadd.xlane.f32.xlu1 %v1568_v38 }
 0x539   : > { %v1578_v21 = vpop.xlane.xlu2 %1577 }
 0x53a   : > { %v1607_v40 = vadd.f32 %v2951_v8, %v1578_v21 }
 0x53c   : > { %1624 = vst.msk [vmem:[%s2958_s29 + $0x20] sm:$0xff] %vm1619_vm0, %v1607_v40 }
 0x541   : > { %v1580_v26 = vpop.xlane.xlu0 %1579 }
 0x542   : > { %v1608_v23 = vadd.f32 %v2951_v8, %v1580_v26 }
 0x544   : > { %1625 = vst.msk [vmem:[%s2958_s29 + $0x28] sm:$0xff] %vm1619_vm0, %v1608_v23 }
 0x552   : > { %v1582_v16 = vpop.xlane.xlu1 %1581 }
 0x553   : > { %v1609_v41 = vadd.f32 %v2951_v8, %v1582_v16 }
 0x555   : > { %1626 = vst.msk [vmem:[%s2958_s29 + $0x30] sm:$0xff] %vm1619_vm0, %v1609_v41 }
 0x55a   : > { %v1584_v22 = vpop.xlane.xlu2 %1583 }
 0x55b   : > { %v1610_v42 = vadd.f32 %v2951_v8, %v1584_v22 }
 0x55d   : > { %1627 = vst.msk [vmem:[%s2958_s29 + $0x38] sm:$0xff] %vm1619_vm0, %v1610_v42 }
 0x564   : > { %v1586_v43 = vpop.xlane.xlu0 %1585 }
 0x565   : > { %v1611_v29 = vadd.f32 %v2951_v8, %v1586_v43 }
 0x567   : > { %1628 = vst.msk [vmem:[%s2958_s29 + $0x40] sm:$0xff] %vm1619_vm0, %v1611_v29 }
 0x56c   : > { %v1588_v44 = vpop.xlane.xlu1 %1587 }
 0x56d   : > { %v1612_v24 = vadd.f32 %v2951_v8, %v1588_v44 }
 0x56f   : > { %1629 = vst.msk [vmem:[%s2958_s29 + $0x48] sm:$0xff] %vm1619_vm0, %v1612_v24 }
 0x576   : > { %v1590_v45 = vpop.xlane.xlu2 %1589 }
 0x577   : > { %v1613_v46 = vadd.f32 %v2951_v8, %v1590_v45 }
 0x579   : > { %1630 = vst.msk [vmem:[%s2958_s29 + $0x50] sm:$0xff] %vm1619_vm0, %v1613_v46 }
 0x57e   : > { %v1592_v47 = vpop.xlane.xlu0 %1591 }
 0x57f   : > { %v1614_v48 = vadd.f32 %v2951_v8, %v1592_v47 }
 0x581   : > { %1631 = vst.msk [vmem:[%s2958_s29 + $0x58] sm:$0xff] %vm1619_vm0, %v1614_v48 }
 0x58a   : > { %v1594_v49 = vpop.xlane.xlu1 %1593 }
 0x58b   : > { %v1615_v50 = vadd.f32 %v2951_v8, %v1594_v49 }
 0x58d   : > { %1632 = vst.msk [vmem:[%s2958_s29 + $0x60] sm:$0xff] %vm1619_vm0, %v1615_v50 }
 0x592   : > { %v1596_v51 = vpop.xlane.xlu2 %1595 }
 0x593   : > { %v1616_v52 = vadd.f32 %v2951_v8, %v1596_v51 }
 0x595   : > { %1633 = vst.msk [vmem:[%s2958_s29 + $0x68] sm:$0xff] %vm1619_vm0, %v1616_v52 }
 0x5a3   : > { %v1598_v53 = vpop.xlane.xlu0 %1597 }
 0x5a4   : > { %v1617_v54 = vadd.f32 %v2951_v8, %v1598_v53 }
 0x5a6   : > { %1634 = vst.msk [vmem:[%s2958_s29 + $0x70] sm:$0xff] %vm1619_vm0, %v1617_v54 }
 0x5ab   : > { %v1600_v55 = vpop.xlane.xlu1 %1599 }
 0x5ac   : > { %v1618_v56 = vadd.f32 %v2951_v8, %v1600_v55 }
 0x5ae   : > { %1635 = vst.msk [vmem:[%s2958_s29 + $0x78] sm:$0xff] %vm1619_vm0, %v1618_v56 }
 0x5af PF: > { %s15_s18 = sadd.s32 1, %s2425_s18  }
 0x5b0   : > { %p12_p4 = scmp.ge.s32.totalorder %s15_s18, 4  }
 0x5b2   :  { %14 = sbr.rel (!%p12_p4) target bundleno = 1 (0x1), region = 76 }

</bundles_post_ra>
